<compile_context>
chip_gen: v6e
topology: v6e:2x2x1
jax: 0.10.0
libtpu: 0.0.40
codegen_flags: <defaults>
</compile_context>

<pallas_src>
import functools
import math

import jax
import jax.numpy as jnp
import numpy as np
from jax.experimental import pallas as pl
from jax.experimental.pallas import tpu as pltpu

_EPS = 1e-5            # nn.InstanceNorm2d default eps
_NEG_SLOPE = 0.2       # nn.LeakyReLU(0.2)
_INV_SQRT2 = 1.0 / math.sqrt(2.0)
_TAPS = tuple((di, dj) for di in (-1, 0, 1) for dj in (-1, 0, 1))
_TAIL_MIN_COUT = 128   # blocks with Cout >= this run channels-on-lanes inside the fused tail


# ----------------------------- small helpers (host side) -----------------------------

def _alive_taps(h, w):
    """3x3/pad-1 taps that can contribute at spatial size (h, w); prunes 8/9 taps at 1x1."""
    return tuple((di, dj) for (di, dj) in _TAPS
                 if (h > 1 or di == 0) and (w > 1 or dj == 0))


def _np_masks(h, w, taps):
    hw = h * w
    rows, cols = np.divmod(np.arange(hw), w)
    m = np.zeros((len(taps), hw), np.float32)
    for k, (di, dj) in enumerate(taps):
        m[k] = ((rows + di >= 0) & (rows + di < h)
                & (cols + dj >= 0) & (cols + dj < w)).astype(np.float32)
    return m


def _stack_w_chw(w_oihw, taps):
    """torch (Cout,Cin,3,3) -> (Cout, K*Cin), columns tap-major, only surviving taps."""
    cout, cin = int(w_oihw.shape[0]), int(w_oihw.shape[1])
    wt = jnp.transpose(w_oihw, (2, 3, 0, 1)).reshape(9, cout, cin)
    idx = [(di + 1) * 3 + (dj + 1) for (di, dj) in taps]
    if len(idx) < 9:
        wt = jnp.take(wt, jnp.asarray(np.asarray(idx, np.int32)), axis=0)
    return jnp.transpose(wt, (1, 0, 2)).reshape(cout, len(taps) * cin)


def _stack_w_hwc(w_oihw, taps):
    """torch (Cout,Cin,3,3) -> (K*Cin, Cout), rows tap-major, only surviving taps."""
    cout, cin = int(w_oihw.shape[0]), int(w_oihw.shape[1])
    wt = jnp.transpose(w_oihw, (2, 3, 1, 0)).reshape(9, cin, cout)
    idx = [(di + 1) * 3 + (dj + 1) for (di, dj) in taps]
    if len(idx) < 9:
        wt = jnp.take(wt, jnp.asarray(np.asarray(idx, np.int32)), axis=0)
    return wt.reshape(len(taps) * cin, cout)


def _padded_bytes(shape, dtype):
    """Approximate VMEM footprint of one buffer after (sublane, lane) tiling."""
    item = int(np.dtype(dtype).itemsize)
    s = list(shape)
    if len(s) >= 1:
        s[-1] = -(-s[-1] // 128) * 128
    if len(s) >= 2:
        sub = 8 * max(1, 4 // item)
        s[-2] = -(-s[-2] // sub) * sub
    total = item
    for d in s:
        total *= int(d)
    return total


def _bcast_spec(shape):
    nd = len(shape)
    return pl.BlockSpec(tuple(int(d) for d in shape), lambda i: (0,) * nd)


# ----------------------------- in-kernel helpers -----------------------------

def _leaky(x):
    return jnp.where(x >= 0, x, _NEG_SLOPE * x)


def _mask_list(m_all, taps):
    masks, mi = [], 0
    for t in taps:
        if t == (0, 0):
            masks.append(None)
        else:
            masks.append(m_all[mi])
            mi += 1
    return masks


def _conv3x3_chw(a, w_stk, taps, masks, h, w):
    """3x3/pad-1 conv, channels-major (Cin, HW) with HW on lanes.
    Surviving taps stacked along the contraction axis -> a single bf16 MXU matmul."""
    hw = h * w
    cin = a.shape[0]
    pieces = []
    for k, (di, dj) in enumerate(taps):
        s = (-(di * w + dj)) % hw
        p = a if s == 0 else pltpu.roll(a, shift=s, axis=1)
        if masks[k] is not None:
            p = p * masks[k]
        pieces.append(p)
    if len(pieces) == 1:
        stacked = pieces[0]
    else:
        stacked = jnp.stack(pieces, axis=0).reshape(len(pieces) * cin, hw)
    return jnp.dot(w_stk, stacked.astype(jnp.bfloat16),
                   preferred_element_type=jnp.float32)


def _conv3x3_hwc(a, w_stk, taps, masks, h, w):
    """3x3/pad-1 conv, channels-on-lanes (N, HW, Cin). One stacked MXU matmul."""
    n, hw, _ = a.shape
    pieces = []
    for k, (di, dj) in enumerate(taps):
        s = (di * w + dj) % hw
        p = a if s == 0 else jnp.concatenate([a[:, s:, :], a[:, :s, :]], axis=1)
        if masks[k] is not None:
            p = p * masks[k]
        pieces.append(p)
    stacked = pieces[0] if len(pieces) == 1 else jnp.concatenate(pieces, axis=2)
    kcin = stacked.shape[2]
    cout = w_stk.shape[1]
    out = jnp.dot(stacked.reshape(n * hw, kcin).astype(jnp.bfloat16), w_stk,
                  preferred_element_type=jnp.float32)
    return out.reshape(n, hw, cout)


def _pool2x2_hwc(x, h, w):
    """2x2 average pool of (N, h*w, C) -> (N, (h//2)*(w//2), C)."""
    rows = []
    for ro in range(h // 2):
        for co in range(w // 2):
            r0 = (2 * ro) * w + 2 * co
            rows.append(x[:, r0:r0 + 1, :] + x[:, r0 + 1:r0 + 2, :]
                        + x[:, r0 + w:r0 + w + 1, :] + x[:, r0 + w + 1:r0 + w + 2, :])
    out = rows[0] if len(rows) == 1 else jnp.concatenate(rows, axis=1)
    return out * 0.25


def _inorm_rows(x, gamma, beta):
    """InstanceNorm for (N, HW, C): per-image, per-channel stats over the HW axis."""
    m = jnp.mean(x, axis=1, keepdims=True)
    xc = x - m
    v = jnp.mean(xc * xc, axis=1, keepdims=True)
    return xc * jax.lax.rsqrt(v + _EPS) * gamma + beta


# ------------------------------ Pallas kernels -------------------------------

def _front_resblk_kernel(*refs, cin, cout, h, w, groups, normalize, learned_sc,
                         taps, n_masked):
    """Fused ResBlk for one image, channels-major (spatial on lanes):
       IN1 -> LeakyReLU -> [2x2 avg-pool via groups] -> conv1 -> IN2 -> LeakyReLU -> conv2
       + (pooled) shortcut [1x1 conv], combined as (res + sc)/sqrt(2)."""
    o_ref = refs[-1]
    it = iter(refs[:-1])
    x_ref = next(it)
    m_all = next(it)[...] if n_masked else None
    w1 = next(it)[...]
    b1 = next(it)[...]
    w2 = next(it)[...]
    b2 = next(it)[...]
    g1 = next(it)[...]
    bt1 = next(it)[...]
    g2 = next(it)[...]
    bt2 = next(it)[...]
    wsc = next(it)[...] if learned_sc else None

    masks = _mask_list(m_all, taps)
    blocks = [x_ref[0, g].astype(jnp.float32) for g in range(groups)]
    inv_g = 1.0 / groups

    # shortcut input: 2x2 avg-pool of the raw x (identity when groups == 1)
    s = blocks[0] if groups == 1 else sum(blocks) * inv_g

    # norm1 (+affine) + LeakyReLU + avg-pool; IN stats over the pre-pool spatial extent
    if normalize:
        m = sum(jnp.mean(b, axis=1, keepdims=True) for b in blocks) * inv_g
        cent = [b - m for b in blocks]
        v = sum(jnp.mean(c * c, axis=1, keepdims=True) for c in cent) * inv_g
        scale = jax.lax.rsqrt(v + _EPS) * g1
        blocks = [c * scale + bt1 for c in cent]
    blocks = [_leaky(b) for b in blocks]
    a = blocks[0] if groups == 1 else sum(blocks) * inv_g      # (cin, hw)

    r = _conv3x3_chw(a, w1, taps, masks, h, w) + b1            # (cout, hw) f32
    if normalize:
        mm = jnp.mean(r, axis=1, keepdims=True)
        rc = r - mm
        vv = jnp.mean(rc * rc, axis=1, keepdims=True)
        r = rc * jax.lax.rsqrt(vv + _EPS) * g2 + bt2
    r = _leaky(r)
    r = _conv3x3_chw(r, w2, taps, masks, h, w) + b2

    if learned_sc:
        s = jnp.dot(wsc, s.astype(jnp.bfloat16), preferred_element_type=jnp.float32)

    o_ref[0] = ((r + s) * _INV_SQRT2).astype(o_ref.dtype)


def _tail_block(x, cfg, m_all, w1, b1, w2, b2, g1, bt1, g2, bt2, wsc):
    """One ResBlk on a VMEM-resident (N, HW, C) value (channels on lanes)."""
    n = x.shape[0]
    h_in, w_in = cfg["h_in"], cfg["w_in"]
    taps = cfg["taps"]
    masks = _mask_list(m_all, taps)

    a = _inorm_rows(x, g1, bt1) if cfg["normalize"] else x
    a = _leaky(a)
    s = x
    if cfg["downsample"]:
        a = _pool2x2_hwc(a, h_in, w_in)
        s = _pool2x2_hwc(s, h_in, w_in)
        h, w = h_in // 2, w_in // 2
    else:
        h, w = h_in, w_in

    r = _conv3x3_hwc(a, w1, taps, masks, h, w) + b1            # (N, hw, cout)
    if cfg["normalize"]:
        r = _inorm_rows(r, g2, bt2)
    r = _leaky(r)
    r = _conv3x3_hwc(r, w2, taps, masks, h, w) + b2

    if cfg["learned_sc"]:
        cin, cout = cfg["cin"], cfg["cout"]
        s = jnp.dot(s.reshape(n * h * w, cin).astype(jnp.bfloat16), wsc,
                    preferred_element_type=jnp.float32).reshape(n, h * w, cout)

    return (r + s) * _INV_SQRT2


def _tail_kernel(*refs, cfgs):
    """Fused tail: all >=128-channel ResBlks + adv MLP in one kernel, whole batch at once.
    Activations stay VMEM/vreg resident between blocks (no HBM round trips)."""
    o_ref = refs[-1]
    it = iter(refs[:-1])
    x = next(it)[...].astype(jnp.float32)                      # (N, HW, Cin0)
    for cfg in cfgs:
        m_all = next(it)[...] if cfg["n_masked"] else None
        w1 = next(it)[...]
        b1 = next(it)[...]
        w2 = next(it)[...]
        b2 = next(it)[...]
        g1 = next(it)[...]
        bt1 = next(it)[...]
        g2 = next(it)[...]
        bt2 = next(it)[...]
        wsc = next(it)[...] if cfg["learned_sc"] else None
        x = _tail_block(x, cfg, m_all, w1, b1, w2, b2, g1, bt1, g2, bt2, wsc)

    lin1_w = next(it)[...]
    lin1_b = next(it)[...]
    lin2_w = next(it)[...]
    lin2_b = next(it)[...]

    n, hwf, cf = x.shape
    if hwf == 1:
        feat = x.reshape(n, cf)                                # matches torch .view(N, -1)
    else:
        # TODO(synk): NCHW flatten order when the final spatial size is > 1x1.
        feat = jnp.swapaxes(x, 1, 2).reshape(n, cf * hwf)
    h1 = jnp.dot(feat.astype(jnp.bfloat16), lin1_w,
                 preferred_element_type=jnp.float32) + lin1_b
    # TODO(synk): nn.Dropout(0.5) is identity at inference; training would need pltpu.prng_*.
    h2 = jnp.dot(h1.astype(jnp.bfloat16), lin2_w,
                 preferred_element_type=jnp.float32) + lin2_b
    o_ref[...] = jnp.tanh(h2).astype(o_ref.dtype)


# ---------------------------- pallas_call wrappers ----------------------------

def res_blk_forward(x_nchw, p, *, downsample=False, normalize=False):
    """Per-block Pallas ResBlk (channels-major), used for the low-channel front blocks.
    x_nchw: (N, Cin, H, W) f32 -> (N, Cout, H', W') f32."""
    # TODO(synk): the upsample path of ResBlk is not ported (ZebraEncoder never uses it).
    n, cin, h0, w0 = x_nchw.shape
    cout = int(p["w1"].shape[0])
    learned_sc = cin != cout
    f32, bf16 = jnp.float32, jnp.bfloat16

    if downsample:
        h1, w1 = h0 // 2, w0 // 2
        groups = 4
        # space-to-depth with a leading group axis: group slices are free leading-axis views
        x = jnp.transpose(x_nchw.reshape(n, cin, h1, 2, w1, 2), (0, 3, 5, 1, 2, 4))
        x = x.reshape(n, 4, cin, h1 * w1)
    else:
        h1, w1 = h0, w0
        groups = 1
        x = x_nchw.reshape(n, 1, cin, h1 * w1)
    hw = h1 * w1

    taps = _alive_taps(h1, w1)
    masked = tuple(t for t in taps if t != (0, 0))
    kt = len(taps)

    operands = [x.astype(f32)]
    if masked:
        operands.append(jnp.asarray(_np_masks(h1, w1, masked).reshape(len(masked), 1, hw), f32))
    operands += [
        _stack_w_chw(p["w1"], taps).astype(bf16),
        p["b1"].reshape(cout, 1).astype(f32),
        _stack_w_chw(p["w2"], taps).astype(bf16),
        p["b2"].reshape(cout, 1).astype(f32),
        p.get("g1", jnp.ones((cin,), f32)).reshape(cin, 1).astype(f32),
        p.get("bt1", jnp.zeros((cin,), f32)).reshape(cin, 1).astype(f32),
        p.get("g2", jnp.ones((cout,), f32)).reshape(cout, 1).astype(f32),
        p.get("bt2", jnp.zeros((cout,), f32)).reshape(cout, 1).astype(f32),
    ]
    if learned_sc:
        operands.append(p["wsc"].reshape(cout, cin).astype(bf16))

    in_specs = [pl.BlockSpec((1, groups, cin, hw), lambda i: (i, 0, 0, 0))]
    in_specs += [_bcast_spec(a.shape) for a in operands[1:]]

    flops = 2 * n * hw * (kt * cin * cout + kt * cout * cout
                          + (cin * cout if learned_sc else 0))
    bytes_accessed = sum(int(a.size) * a.dtype.itemsize for a in operands) + n * cout * hw * 4
    cost = pl.CostEstimate(flops=int(flops),
                           transcendentals=int(n * (cin + cout)) if normalize else 0,
                           bytes_accessed=int(bytes_accessed))

    need = 2 * (_padded_bytes((groups, cin, hw), f32) + _padded_bytes((cout, hw), f32))
    need += 2 * sum(_padded_bytes(a.shape, a.dtype) for a in operands[1:])
    vmem_limit = int(min(max(need + (4 << 20), 32 << 20), 56 << 20))

    out = pl.pallas_call(
        functools.partial(_front_resblk_kernel, cin=cin, cout=cout, h=h1, w=w1,
                          groups=groups, normalize=normalize, learned_sc=learned_sc,
                          taps=taps, n_masked=len(masked)),
        out_shape=jax.ShapeDtypeStruct((n, cout, hw), f32),
        grid=(n,),
        in_specs=in_specs,
        out_specs=pl.BlockSpec((1, cout, hw), lambda i: (i, 0, 0)),
        compiler_params=pltpu.CompilerParams(
            dimension_semantics=("parallel",), vmem_limit_bytes=vmem_limit),
        cost_estimate=cost,
    )(*operands)
    return out.reshape(n, cout, h1, w1)


def tail_forward(x_nchw, tail_blocks, adv_params, *, normalize=True):
    """Fused tail: channels-on-lanes ResBlks (Cout >= 128) + adv MLP in ONE pallas_call."""
    n, c0, h, w = x_nchw.shape
    f32, bf16 = jnp.float32, jnp.bfloat16
    x_hwc = jnp.transpose(x_nchw.reshape(n, c0, h * w), (0, 2, 1)).astype(f32)

    operands = [x_hwc]
    cfgs = []
    flops = 0
    cur_c, cur_h, cur_w = c0, h, w
    for p in tail_blocks:
        cout = int(p["w1"].shape[0])
        ds = bool(p["downsample"])
        hc, wc = (cur_h // 2, cur_w // 2) if ds else (cur_h, cur_w)
        taps = _alive_taps(hc, wc)
        masked = tuple(t for t in taps if t != (0, 0))
        learned_sc = cur_c != cout
        if masked:
            operands.append(
                jnp.asarray(_np_masks(hc, wc, masked).reshape(len(masked), hc * wc, 1), f32))
        operands += [
            _stack_w_hwc(p["w1"], taps).astype(bf16),
            p["b1"].reshape(1, cout).astype(f32),
            _stack_w_hwc(p["w2"], taps).astype(bf16),
            p["b2"].reshape(1, cout).astype(f32),
            p.get("g1", jnp.ones((cur_c,), f32)).reshape(1, cur_c).astype(f32),
            p.get("bt1", jnp.zeros((cur_c,), f32)).reshape(1, cur_c).astype(f32),
            p.get("g2", jnp.ones((cout,), f32)).reshape(1, cout).astype(f32),
            p.get("bt2", jnp.zeros((cout,), f32)).reshape(1, cout).astype(f32),
        ]
        if learned_sc:
            operands.append(p["wsc"].reshape(cout, cur_c).T.astype(bf16))
        cfgs.append(dict(cin=cur_c, cout=cout, h_in=cur_h, w_in=cur_w, downsample=ds,
                         normalize=normalize, learned_sc=learned_sc, taps=taps,
                         n_masked=len(masked)))
        kt = len(taps)
        flops += 2 * n * hc * wc * (kt * cur_c * cout + kt * cout * cout
                                    + (cur_c * cout if learned_sc else 0))
        cur_c, cur_h, cur_w = cout, hc, wc

    lin1_w = jnp.transpose(adv_params["lin1_w"]).astype(bf16)     # (feat, 512)
    lin1_b = adv_params["lin1_b"].reshape(1, -1).astype(f32)
    lin2_w = jnp.transpose(adv_params["lin2_w"]).astype(bf16)     # (512, latent)
    lin2_b = adv_params["lin2_b"].reshape(1, -1).astype(f32)
    latent = int(lin2_w.shape[1])
    operands += [lin1_w, lin1_b, lin2_w, lin2_b]
    flops += 2 * n * (int(lin1_w.shape[0]) * int(lin1_w.shape[1])
                      + int(lin2_w.shape[0]) * latent)

    bytes_accessed = sum(int(a.size) * a.dtype.itemsize for a in operands) + n * latent * 4
    cost = pl.CostEstimate(flops=int(flops),
                           transcendentals=int(n * 8 * 1024),
                           bytes_accessed=int(bytes_accessed))
    need = sum(_padded_bytes(a.shape, a.dtype) for a in operands)
    vmem_limit = int(min(max(2 * need + (8 << 20), 32 << 20), 56 << 20))

    return pl.pallas_call(
        functools.partial(_tail_kernel, cfgs=tuple(cfgs)),
        out_shape=jax.ShapeDtypeStruct((n, latent), f32),
        compiler_params=pltpu.CompilerParams(vmem_limit_bytes=vmem_limit),
        cost_estimate=cost,
    )(*operands)


# ----------------------------- ZebraEncoder forward ----------------------------

def _zebra_cfg(channels):
    return ((channels, 16, True), (16, 32, False), (32, 64, True), (64, 128, False),
            (128, 256, True), (256, 512, False), (512, 512, True), (512, 512, False))


def zebra_encoder_forward(x_nchw, params):
    blocks = params["blocks"]
    tail_start = len(blocks)
    for i, b in enumerate(blocks):
        if int(b["w1"].shape[0]) >= _TAIL_MIN_COUT:
            tail_start = i
            break
    x = x_nchw
    for b in blocks[:tail_start]:
        x = res_blk_forward(x, b, downsample=b["downsample"], normalize=True)
    assert tail_start < len(blocks), "ZebraEncoder config always has >=128-channel blocks"
    return tail_forward(x, blocks[tail_start:], params["adv"], normalize=True)


# --------------------------- pure-JAX reference (NCHW) -------------------------

def _ref_resblk(x, p, *, upsample=False, downsample=False, normalize=False):
    cin = x.shape[1]
    cout = p["w1"].shape[0]
    learned_sc = cin != cout

    def conv(z, w, b=None, pad=1):
        y = jax.lax.conv_general_dilated(z, w, (1, 1), [(pad, pad), (pad, pad)],
                                         dimension_numbers=("NCHW", "OIHW", "NCHW"))
        return y if b is None else y + b[None, :, None, None]

    def inorm(z, g, bt):
        m = z.mean(axis=(2, 3), keepdims=True)
        v = ((z - m) ** 2).mean(axis=(2, 3), keepdims=True)
        return (z - m) * jax.lax.rsqrt(v + _EPS) * g[None, :, None, None] \
            + bt[None, :, None, None]

    def actv(z):
        return jnp.where(z >= 0, z, _NEG_SLOPE * z)

    def up(z):
        return jnp.repeat(jnp.repeat(z, 2, axis=2), 2, axis=3)

    def down(z):
        nn_, cc, hh, ww = z.shape
        return z.reshape(nn_, cc, hh // 2, 2, ww // 2, 2).mean(axis=(3, 5))

    r = x
    if normalize:
        r = inorm(r, p["g1"], p["bt1"])
    r = actv(r)
    if upsample:
        r = up(r)
    if downsample:
        r = down(r)
    r = conv(r, p["w1"], p["b1"])
    if normalize:
        r = inorm(r, p["g2"], p["bt2"])
    r = actv(r)
    r = conv(r, p["w2"], p["b2"])

    s = x
    if upsample:
        s = up(s)
    if downsample:
        s = down(s)
    if learned_sc:
        s = conv(s, p["wsc"], None, pad=0)
    return (r + s) * _INV_SQRT2


def _ref_encoder(x, params):
    for blk in params["blocks"]:
        x = _ref_resblk(x, blk, downsample=blk["downsample"], normalize=True)
    feat = x.reshape(x.shape[0], -1)
    a = params["adv"]
    h = feat @ a["lin1_w"].T + a["lin1_b"]
    h = h @ a["lin2_w"].T + a["lin2_b"]        # Dropout(0.5) is identity at inference
    return jnp.tanh(h)


# ----------------------------------- params ------------------------------------

def _make_resblk_params(key, cin, cout, downsample):
    ks = jax.random.split(key, 9)
    s1, s2 = 1.0 / math.sqrt(9 * cin), 1.0 / math.sqrt(9 * cout)
    p = {
        "downsample": downsample,
        "w1": s1 * jax.random.normal(ks[0], (cout, cin, 3, 3), jnp.float32),
        "b1": 0.1 * jax.random.normal(ks[1], (cout,), jnp.float32),
        "w2": s2 * jax.random.normal(ks[2], (cout, cout, 3, 3), jnp.float32),
        "b2": 0.1 * jax.random.normal(ks[3], (cout,), jnp.float32),
        "g1": 1.0 + 0.1 * jax.random.normal(ks[4], (cin,), jnp.float32),
        "bt1": 0.1 * jax.random.normal(ks[5], (cin,), jnp.float32),
        "g2": 1.0 + 0.1 * jax.random.normal(ks[6], (cout,), jnp.float32),
        "bt2": 0.1 * jax.random.normal(ks[7], (cout,), jnp.float32),
    }
    if cin != cout:
        p["wsc"] = (1.0 / math.sqrt(cin)) * jax.random.normal(
            ks[8], (cout, cin, 1, 1), jnp.float32)
    return p


def _make_encoder_params(key, channels, img_size, latent_dim):
    cfg = _zebra_cfg(channels)
    keys = jax.random.split(key, len(cfg) + 3)
    blocks = [_make_resblk_params(k, ci, co, ds)
              for k, (ci, co, ds) in zip(keys[:len(cfg)], cfg)]
    feat = 512 * (img_size // 16) * (img_size // 16)
    adv = {
        "lin1_w": (1.0 / math.sqrt(feat)) * jax.random.normal(
            keys[-3], (512, feat), jnp.float32),
        "lin1_b": 0.05 * jax.random.normal(keys[-2], (512,), jnp.float32),
        "lin2_w": (1.0 / math.sqrt(512)) * jax.random.normal(
            keys[-1], (latent_dim, 512), jnp.float32),
        "lin2_b": jnp.zeros((latent_dim,), jnp.float32),
    }
    return {"blocks": blocks, "adv": adv}


# ------------------------------------ demo -------------------------------------

if __name__ == "__main__":
    N, CHANNELS, IMG, LATENT = 2, 4, 16, 32

    key = jax.random.PRNGKey(0)
    k_x, k_p = jax.random.split(key)
    params = _make_encoder_params(k_p, CHANNELS, IMG, LATENT)
    x = jax.random.normal(k_x, (N, CHANNELS, IMG, IMG), jnp.float32)

    # single front-ResBlk check (downsample + normalize + learned shortcut)
    blk0 = params["blocks"][0]
    out_blk = jax.block_until_ready(
        res_blk_forward(x, blk0, downsample=True, normalize=True))
    ref_blk = _ref_resblk(x, blk0, downsample=True, normalize=True)
    np.testing.assert_allclose(np.asarray(out_blk), np.asarray(ref_blk),
                               rtol=2e-2, atol=2e-2)

    # full ZebraEncoder forward: 3 front kernels + 1 fused tail kernel (blocks 4-8 + adv MLP)
    out = jax.block_until_ready(zebra_encoder_forward(x, params))
    ref = jax.block_until_ready(_ref_encoder(x, params))
    np.testing.assert_allclose(np.asarray(out), np.asarray(ref), rtol=5e-2, atol=5e-2)

    print("KERNEL_OK")
</pallas_src>

<mosaic_0001>
module attributes {stable_mosaic.version = 11 : i64} {
  func.func @_front_resblk_kernel(%arg0: i32, %arg1: memref<1x4x4x64xf32, #tpu.memory_space<vmem>>, %arg2: memref<8x1x64xf32, #tpu.memory_space<vmem>>, %arg3: memref<16x36xbf16, #tpu.memory_space<vmem>>, %arg4: memref<16x1xf32, #tpu.memory_space<vmem>>, %arg5: memref<16x144xbf16, #tpu.memory_space<vmem>>, %arg6: memref<16x1xf32, #tpu.memory_space<vmem>>, %arg7: memref<4x1xf32, #tpu.memory_space<vmem>>, %arg8: memref<4x1xf32, #tpu.memory_space<vmem>>, %arg9: memref<16x1xf32, #tpu.memory_space<vmem>>, %arg10: memref<16x1xf32, #tpu.memory_space<vmem>>, %arg11: memref<16x4xbf16, #tpu.memory_space<vmem>>, %arg12: memref<1x16x64xf32, #tpu.memory_space<vmem>>) attributes {dimension_semantics = [#tpu.dimension_semantics<parallel>], iteration_bounds = array<i64: 2>, scalar_prefetch = 0 : i64, scratch_operands = 0 : i64, tpu.core_type = #tpu.core_type<tc>, window_params = [{transform_indices = @transform_0, window_bounds = array<i64: 1, 4, 4, 64>}, {pipeline_mode = #tpu.pipeline_mode<synchronous>, transform_indices = @transform_1, window_bounds = array<i64: 8, 1, 64>}, {pipeline_mode = #tpu.pipeline_mode<synchronous>, transform_indices = @transform_2, window_bounds = array<i64: 16, 36>}, {pipeline_mode = #tpu.pipeline_mode<synchronous>, transform_indices = @transform_3, window_bounds = array<i64: 16, 1>}, {pipeline_mode = #tpu.pipeline_mode<synchronous>, transform_indices = @transform_4, window_bounds = array<i64: 16, 144>}, {pipeline_mode = #tpu.pipeline_mode<synchronous>, transform_indices = @transform_5, window_bounds = array<i64: 16, 1>}, {pipeline_mode = #tpu.pipeline_mode<synchronous>, transform_indices = @transform_6, window_bounds = array<i64: 4, 1>}, {pipeline_mode = #tpu.pipeline_mode<synchronous>, transform_indices = @transform_7, window_bounds = array<i64: 4, 1>}, {pipeline_mode = #tpu.pipeline_mode<synchronous>, transform_indices = @transform_8, window_bounds = array<i64: 16, 1>}, {pipeline_mode = #tpu.pipeline_mode<synchronous>, transform_indices = @transform_9, window_bounds = array<i64: 16, 1>}, {pipeline_mode = #tpu.pipeline_mode<synchronous>, transform_indices = @transform_10, window_bounds = array<i64: 16, 4>}, {transform_indices = @transform_11, window_bounds = array<i64: 1, 16, 64>}]} {
    %c0 = arith.constant 0 : index
    %c0_0 = arith.constant 0 : index
    %c0_1 = arith.constant 0 : index
    %0 = vector.load %arg2[%c0, %c0_0, %c0_1] : memref<8x1x64xf32, #tpu.memory_space<vmem>>, vector<8x1x64xf32>
    %c0_2 = arith.constant 0 : index
    %c0_3 = arith.constant 0 : index
    %1 = vector.load %arg3[%c0_2, %c0_3] : memref<16x36xbf16, #tpu.memory_space<vmem>>, vector<16x36xbf16>
    %c0_4 = arith.constant 0 : index
    %c0_5 = arith.constant 0 : index
    %2 = vector.load %arg4[%c0_4, %c0_5] : memref<16x1xf32, #tpu.memory_space<vmem>>, vector<16x1xf32>
    %c0_6 = arith.constant 0 : index
    %c0_7 = arith.constant 0 : index
    %3 = vector.load %arg5[%c0_6, %c0_7] : memref<16x144xbf16, #tpu.memory_space<vmem>>, vector<16x144xbf16>
    %c0_8 = arith.constant 0 : index
    %c0_9 = arith.constant 0 : index
    %4 = vector.load %arg6[%c0_8, %c0_9] : memref<16x1xf32, #tpu.memory_space<vmem>>, vector<16x1xf32>
    %c0_10 = arith.constant 0 : index
    %c0_11 = arith.constant 0 : index
    %5 = vector.load %arg7[%c0_10, %c0_11] : memref<4x1xf32, #tpu.memory_space<vmem>>, vector<4x1xf32>
    %c0_12 = arith.constant 0 : index
    %c0_13 = arith.constant 0 : index
    %6 = vector.load %arg8[%c0_12, %c0_13] : memref<4x1xf32, #tpu.memory_space<vmem>>, vector<4x1xf32>
    %c0_14 = arith.constant 0 : index
    %c0_15 = arith.constant 0 : index
    %7 = vector.load %arg9[%c0_14, %c0_15] : memref<16x1xf32, #tpu.memory_space<vmem>>, vector<16x1xf32>
    %c0_16 = arith.constant 0 : index
    %c0_17 = arith.constant 0 : index
    %8 = vector.load %arg10[%c0_16, %c0_17] : memref<16x1xf32, #tpu.memory_space<vmem>>, vector<16x1xf32>
    %c0_18 = arith.constant 0 : index
    %c0_19 = arith.constant 0 : index
    %9 = vector.load %arg11[%c0_18, %c0_19] : memref<16x4xbf16, #tpu.memory_space<vmem>>, vector<16x4xbf16>
    %10 = vector.extract_strided_slice %0 {offsets = [0, 0, 0], sizes = [1, 1, 64], strides = [1, 1, 1]} : vector<8x1x64xf32> to vector<1x1x64xf32>
    %11 = vector.shape_cast %10 : vector<1x1x64xf32> to vector<1x64xf32>
    %12 = vector.extract_strided_slice %0 {offsets = [1, 0, 0], sizes = [1, 1, 64], strides = [1, 1, 1]} : vector<8x1x64xf32> to vector<1x1x64xf32>
    %13 = vector.shape_cast %12 : vector<1x1x64xf32> to vector<1x64xf32>
    %14 = vector.extract_strided_slice %0 {offsets = [2, 0, 0], sizes = [1, 1, 64], strides = [1, 1, 1]} : vector<8x1x64xf32> to vector<1x1x64xf32>
    %15 = vector.shape_cast %14 : vector<1x1x64xf32> to vector<1x64xf32>
    %16 = vector.extract_strided_slice %0 {offsets = [3, 0, 0], sizes = [1, 1, 64], strides = [1, 1, 1]} : vector<8x1x64xf32> to vector<1x1x64xf32>
    %17 = vector.shape_cast %16 : vector<1x1x64xf32> to vector<1x64xf32>
    %18 = vector.extract_strided_slice %0 {offsets = [4, 0, 0], sizes = [1, 1, 64], strides = [1, 1, 1]} : vector<8x1x64xf32> to vector<1x1x64xf32>
    %19 = vector.shape_cast %18 : vector<1x1x64xf32> to vector<1x64xf32>
    %20 = vector.extract_strided_slice %0 {offsets = [5, 0, 0], sizes = [1, 1, 64], strides = [1, 1, 1]} : vector<8x1x64xf32> to vector<1x1x64xf32>
    %21 = vector.shape_cast %20 : vector<1x1x64xf32> to vector<1x64xf32>
    %22 = vector.extract_strided_slice %0 {offsets = [6, 0, 0], sizes = [1, 1, 64], strides = [1, 1, 1]} : vector<8x1x64xf32> to vector<1x1x64xf32>
    %23 = vector.shape_cast %22 : vector<1x1x64xf32> to vector<1x64xf32>
    %24 = vector.extract_strided_slice %0 {offsets = [7, 0, 0], sizes = [1, 1, 64], strides = [1, 1, 1]} : vector<8x1x64xf32> to vector<1x1x64xf32>
    %25 = vector.shape_cast %24 : vector<1x1x64xf32> to vector<1x64xf32>
    %c0_20 = arith.constant 0 : index
    %c0_21 = arith.constant 0 : index
    %c0_22 = arith.constant 0 : index
    %c0_23 = arith.constant 0 : index
    %26 = vector.load %arg1[%c0_20, %c0_21, %c0_22, %c0_23] : memref<1x4x4x64xf32, #tpu.memory_space<vmem>>, vector<1x1x4x64xf32>
    %27 = vector.shape_cast %26 : vector<1x1x4x64xf32> to vector<4x64xf32>
    %c0_24 = arith.constant 0 : index
    %c1 = arith.constant 1 : index
    %c0_25 = arith.constant 0 : index
    %c0_26 = arith.constant 0 : index
    %28 = vector.load %arg1[%c0_24, %c1, %c0_25, %c0_26] : memref<1x4x4x64xf32, #tpu.memory_space<vmem>>, vector<1x1x4x64xf32>
    %29 = vector.shape_cast %28 : vector<1x1x4x64xf32> to vector<4x64xf32>
    %c0_27 = arith.constant 0 : index
    %c2 = arith.constant 2 : index
    %c0_28 = arith.constant 0 : index
    %c0_29 = arith.constant 0 : index
    %30 = vector.load %arg1[%c0_27, %c2, %c0_28, %c0_29] : memref<1x4x4x64xf32, #tpu.memory_space<vmem>>, vector<1x1x4x64xf32>
    %31 = vector.shape_cast %30 : vector<1x1x4x64xf32> to vector<4x64xf32>
    %c0_30 = arith.constant 0 : index
    %c3 = arith.constant 3 : index
    %c0_31 = arith.constant 0 : index
    %c0_32 = arith.constant 0 : index
    %32 = vector.load %arg1[%c0_30, %c3, %c0_31, %c0_32] : memref<1x4x4x64xf32, #tpu.memory_space<vmem>>, vector<1x1x4x64xf32>
    %33 = vector.shape_cast %32 : vector<1x1x4x64xf32> to vector<4x64xf32>
    %cst = arith.constant 0.000000e+00 : f32
    %34 = vector.broadcast %cst : f32 to vector<4x64xf32>
    %35 = arith.addf %34, %27 : vector<4x64xf32>
    %36 = arith.addf %35, %29 : vector<4x64xf32>
    %37 = arith.addf %36, %31 : vector<4x64xf32>
    %38 = arith.addf %37, %33 : vector<4x64xf32>
    %cst_33 = arith.constant 2.500000e-01 : f32
    %39 = vector.broadcast %cst_33 : f32 to vector<4x64xf32>
    %40 = arith.mulf %38, %39 : vector<4x64xf32>
    %cst_34 = arith.constant dense<0.000000e+00> : vector<4xf32>
    %41 = vector.multi_reduction <add>, %27, %cst_34 [1] : vector<4x64xf32> to vector<4xf32>
    %42 = vector.shape_cast %41 : vector<4xf32> to vector<4x1xf32>
    %cst_35 = arith.constant 6.400000e+01 : f32
    %43 = vector.broadcast %cst_35 : f32 to vector<4x1xf32>
    %44 = arith.divf %42, %43 : vector<4x1xf32>
    %cst_36 = arith.constant 0.000000e+00 : f32
    %45 = vector.broadcast %cst_36 : f32 to vector<4x1xf32>
    %46 = arith.addf %45, %44 : vector<4x1xf32>
    %cst_37 = arith.constant dense<0.000000e+00> : vector<4xf32>
    %47 = vector.multi_reduction <add>, %29, %cst_37 [1] : vector<4x64xf32> to vector<4xf32>
    %48 = vector.shape_cast %47 : vector<4xf32> to vector<4x1xf32>
    %cst_38 = arith.constant 6.400000e+01 : f32
    %49 = vector.broadcast %cst_38 : f32 to vector<4x1xf32>
    %50 = arith.divf %48, %49 : vector<4x1xf32>
    %51 = arith.addf %46, %50 : vector<4x1xf32>
    %cst_39 = arith.constant dense<0.000000e+00> : vector<4xf32>
    %52 = vector.multi_reduction <add>, %31, %cst_39 [1] : vector<4x64xf32> to vector<4xf32>
    %53 = vector.shape_cast %52 : vector<4xf32> to vector<4x1xf32>
    %cst_40 = arith.constant 6.400000e+01 : f32
    %54 = vector.broadcast %cst_40 : f32 to vector<4x1xf32>
    %55 = arith.divf %53, %54 : vector<4x1xf32>
    %56 = arith.addf %51, %55 : vector<4x1xf32>
    %cst_41 = arith.constant dense<0.000000e+00> : vector<4xf32>
    %57 = vector.multi_reduction <add>, %33, %cst_41 [1] : vector<4x64xf32> to vector<4xf32>
    %58 = vector.shape_cast %57 : vector<4xf32> to vector<4x1xf32>
    %cst_42 = arith.constant 6.400000e+01 : f32
    %59 = vector.broadcast %cst_42 : f32 to vector<4x1xf32>
    %60 = arith.divf %58, %59 : vector<4x1xf32>
    %61 = arith.addf %56, %60 : vector<4x1xf32>
    %cst_43 = arith.constant 2.500000e-01 : f32
    %62 = vector.broadcast %cst_43 : f32 to vector<4x1xf32>
    %63 = arith.mulf %61, %62 : vector<4x1xf32>
    %64 = vector.broadcast %63 : vector<4x1xf32> to vector<4x64xf32>
    %65 = arith.subf %27, %64 : vector<4x64xf32>
    %66 = vector.broadcast %63 : vector<4x1xf32> to vector<4x64xf32>
    %67 = arith.subf %29, %66 : vector<4x64xf32>
    %68 = vector.broadcast %63 : vector<4x1xf32> to vector<4x64xf32>
    %69 = arith.subf %31, %68 : vector<4x64xf32>
    %70 = vector.broadcast %63 : vector<4x1xf32> to vector<4x64xf32>
    %71 = arith.subf %33, %70 : vector<4x64xf32>
    %72 = arith.mulf %65, %65 : vector<4x64xf32>
    %cst_44 = arith.constant dense<0.000000e+00> : vector<4xf32>
    %73 = vector.multi_reduction <add>, %72, %cst_44 [1] : vector<4x64xf32> to vector<4xf32>
    %74 = vector.shape_cast %73 : vector<4xf32> to vector<4x1xf32>
    %cst_45 = arith.constant 6.400000e+01 : f32
    %75 = vector.broadcast %cst_45 : f32 to vector<4x1xf32>
    %76 = arith.divf %74, %75 : vector<4x1xf32>
    %cst_46 = arith.constant 0.000000e+00 : f32
    %77 = vector.broadcast %cst_46 : f32 to vector<4x1xf32>
    %78 = arith.addf %77, %76 : vector<4x1xf32>
    %79 = arith.mulf %67, %67 : vector<4x64xf32>
    %cst_47 = arith.constant dense<0.000000e+00> : vector<4xf32>
    %80 = vector.multi_reduction <add>, %79, %cst_47 [1] : vector<4x64xf32> to vector<4xf32>
    %81 = vector.shape_cast %80 : vector<4xf32> to vector<4x1xf32>
    %cst_48 = arith.constant 6.400000e+01 : f32
    %82 = vector.broadcast %cst_48 : f32 to vector<4x1xf32>
    %83 = arith.divf %81, %82 : vector<4x1xf32>
    %84 = arith.addf %78, %83 : vector<4x1xf32>
    %85 = arith.mulf %69, %69 : vector<4x64xf32>
    %cst_49 = arith.constant dense<0.000000e+00> : vector<4xf32>
    %86 = vector.multi_reduction <add>, %85, %cst_49 [1] : vector<4x64xf32> to vector<4xf32>
    %87 = vector.shape_cast %86 : vector<4xf32> to vector<4x1xf32>
    %cst_50 = arith.constant 6.400000e+01 : f32
    %88 = vector.broadcast %cst_50 : f32 to vector<4x1xf32>
    %89 = arith.divf %87, %88 : vector<4x1xf32>
    %90 = arith.addf %84, %89 : vector<4x1xf32>
    %91 = arith.mulf %71, %71 : vector<4x64xf32>
    %cst_51 = arith.constant dense<0.000000e+00> : vector<4xf32>
    %92 = vector.multi_reduction <add>, %91, %cst_51 [1] : vector<4x64xf32> to vector<4xf32>
    %93 = vector.shape_cast %92 : vector<4xf32> to vector<4x1xf32>
    %cst_52 = arith.constant 6.400000e+01 : f32
    %94 = vector.broadcast %cst_52 : f32 to vector<4x1xf32>
    %95 = arith.divf %93, %94 : vector<4x1xf32>
    %96 = arith.addf %90, %95 : vector<4x1xf32>
    %cst_53 = arith.constant 2.500000e-01 : f32
    %97 = vector.broadcast %cst_53 : f32 to vector<4x1xf32>
    %98 = arith.mulf %96, %97 : vector<4x1xf32>
    %cst_54 = arith.constant 9.99999974E-6 : f32
    %99 = vector.broadcast %cst_54 : f32 to vector<4x1xf32>
    %100 = arith.addf %98, %99 : vector<4x1xf32>
    %101 = math.rsqrt %100 : vector<4x1xf32>
    %102 = arith.mulf %101, %5 : vector<4x1xf32>
    %103 = vector.broadcast %102 : vector<4x1xf32> to vector<4x64xf32>
    %104 = arith.mulf %65, %103 : vector<4x64xf32>
    %105 = vector.broadcast %6 : vector<4x1xf32> to vector<4x64xf32>
    %106 = arith.addf %104, %105 : vector<4x64xf32>
    %107 = vector.broadcast %102 : vector<4x1xf32> to vector<4x64xf32>
    %108 = arith.mulf %67, %107 : vector<4x64xf32>
    %109 = vector.broadcast %6 : vector<4x1xf32> to vector<4x64xf32>
    %110 = arith.addf %108, %109 : vector<4x64xf32>
    %111 = vector.broadcast %102 : vector<4x1xf32> to vector<4x64xf32>
    %112 = arith.mulf %69, %111 : vector<4x64xf32>
    %113 = vector.broadcast %6 : vector<4x1xf32> to vector<4x64xf32>
    %114 = arith.addf %112, %113 : vector<4x64xf32>
    %115 = vector.broadcast %102 : vector<4x1xf32> to vector<4x64xf32>
    %116 = arith.mulf %71, %115 : vector<4x64xf32>
    %117 = vector.broadcast %6 : vector<4x1xf32> to vector<4x64xf32>
    %118 = arith.addf %116, %117 : vector<4x64xf32>
    %cst_55 = arith.constant 0.000000e+00 : f32
    %119 = vector.broadcast %cst_55 : f32 to vector<4x64xf32>
    %120 = arith.cmpf oge, %106, %119 : vector<4x64xf32>
    %cst_56 = arith.constant 2.000000e-01 : f32
    %121 = vector.broadcast %cst_56 : f32 to vector<4x64xf32>
    %122 = arith.mulf %121, %106 : vector<4x64xf32>
    %123 = arith.select %120, %106, %122 : vector<4x64xi1>, vector<4x64xf32>
    %cst_57 = arith.constant 0.000000e+00 : f32
    %124 = vector.broadcast %cst_57 : f32 to vector<4x64xf32>
    %125 = arith.cmpf oge, %110, %124 : vector<4x64xf32>
    %cst_58 = arith.constant 2.000000e-01 : f32
    %126 = vector.broadcast %cst_58 : f32 to vector<4x64xf32>
    %127 = arith.mulf %126, %110 : vector<4x64xf32>
    %128 = arith.select %125, %110, %127 : vector<4x64xi1>, vector<4x64xf32>
    %cst_59 = arith.constant 0.000000e+00 : f32
    %129 = vector.broadcast %cst_59 : f32 to vector<4x64xf32>
    %130 = arith.cmpf oge, %114, %129 : vector<4x64xf32>
    %cst_60 = arith.constant 2.000000e-01 : f32
    %131 = vector.broadcast %cst_60 : f32 to vector<4x64xf32>
    %132 = arith.mulf %131, %114 : vector<4x64xf32>
    %133 = arith.select %130, %114, %132 : vector<4x64xi1>, vector<4x64xf32>
    %cst_61 = arith.constant 0.000000e+00 : f32
    %134 = vector.broadcast %cst_61 : f32 to vector<4x64xf32>
    %135 = arith.cmpf oge, %118, %134 : vector<4x64xf32>
    %cst_62 = arith.constant 2.000000e-01 : f32
    %136 = vector.broadcast %cst_62 : f32 to vector<4x64xf32>
    %137 = arith.mulf %136, %118 : vector<4x64xf32>
    %138 = arith.select %135, %118, %137 : vector<4x64xi1>, vector<4x64xf32>
    %cst_63 = arith.constant 0.000000e+00 : f32
    %139 = vector.broadcast %cst_63 : f32 to vector<4x64xf32>
    %140 = arith.addf %139, %123 : vector<4x64xf32>
    %141 = arith.addf %140, %128 : vector<4x64xf32>
    %142 = arith.addf %141, %133 : vector<4x64xf32>
    %143 = arith.addf %142, %138 : vector<4x64xf32>
    %cst_64 = arith.constant 2.500000e-01 : f32
    %144 = vector.broadcast %cst_64 : f32 to vector<4x64xf32>
    %145 = arith.mulf %143, %144 : vector<4x64xf32>
    %c9_i32 = arith.constant 9 : i32
    %146 = tpu.dynamic_rotate %145 by %c9_i32 dim 1 : vector<4x64xf32>, i32 -> vector<4x64xf32>
    %147 = vector.broadcast %11 : vector<1x64xf32> to vector<4x64xf32>
    %148 = arith.mulf %146, %147 : vector<4x64xf32>
    %c8_i32 = arith.constant 8 : i32
    %149 = tpu.dynamic_rotate %145 by %c8_i32 dim 1 : vector<4x64xf32>, i32 -> vector<4x64xf32>
    %150 = vector.broadcast %13 : vector<1x64xf32> to vector<4x64xf32>
    %151 = arith.mulf %149, %150 : vector<4x64xf32>
    %c7_i32 = arith.constant 7 : i32
    %152 = tpu.dynamic_rotate %145 by %c7_i32 dim 1 : vector<4x64xf32>, i32 -> vector<4x64xf32>
    %153 = vector.broadcast %15 : vector<1x64xf32> to vector<4x64xf32>
    %154 = arith.mulf %152, %153 : vector<4x64xf32>
    %c1_i32 = arith.constant 1 : i32
    %155 = tpu.dynamic_rotate %145 by %c1_i32 dim 1 : vector<4x64xf32>, i32 -> vector<4x64xf32>
    %156 = vector.broadcast %17 : vector<1x64xf32> to vector<4x64xf32>
    %157 = arith.mulf %155, %156 : vector<4x64xf32>
    %c63_i32 = arith.constant 63 : i32
    %158 = tpu.dynamic_rotate %145 by %c63_i32 dim 1 : vector<4x64xf32>, i32 -> vector<4x64xf32>
    %159 = vector.broadcast %19 : vector<1x64xf32> to vector<4x64xf32>
    %160 = arith.mulf %158, %159 : vector<4x64xf32>
    %c57_i32 = arith.constant 57 : i32
    %161 = tpu.dynamic_rotate %145 by %c57_i32 dim 1 : vector<4x64xf32>, i32 -> vector<4x64xf32>
    %162 = vector.broadcast %21 : vector<1x64xf32> to vector<4x64xf32>
    %163 = arith.mulf %161, %162 : vector<4x64xf32>
    %c56_i32 = arith.constant 56 : i32
    %164 = tpu.dynamic_rotate %145 by %c56_i32 dim 1 : vector<4x64xf32>, i32 -> vector<4x64xf32>
    %165 = vector.broadcast %23 : vector<1x64xf32> to vector<4x64xf32>
    %166 = arith.mulf %164, %165 : vector<4x64xf32>
    %c55_i32 = arith.constant 55 : i32
    %167 = tpu.dynamic_rotate %145 by %c55_i32 dim 1 : vector<4x64xf32>, i32 -> vector<4x64xf32>
    %168 = vector.broadcast %25 : vector<1x64xf32> to vector<4x64xf32>
    %169 = arith.mulf %167, %168 : vector<4x64xf32>
    %170 = vector.shape_cast %148 : vector<4x64xf32> to vector<1x4x64xf32>
    %171 = vector.shape_cast %151 : vector<4x64xf32> to vector<1x4x64xf32>
    %172 = vector.shape_cast %154 : vector<4x64xf32> to vector<1x4x64xf32>
    %173 = vector.shape_cast %157 : vector<4x64xf32> to vector<1x4x64xf32>
    %174 = vector.shape_cast %145 : vector<4x64xf32> to vector<1x4x64xf32>
    %175 = vector.shape_cast %160 : vector<4x64xf32> to vector<1x4x64xf32>
    %176 = vector.shape_cast %163 : vector<4x64xf32> to vector<1x4x64xf32>
    %177 = vector.shape_cast %166 : vector<4x64xf32> to vector<1x4x64xf32>
    %178 = vector.shape_cast %169 : vector<4x64xf32> to vector<1x4x64xf32>
    %179 = tpu.concatenate %170, %171, %172, %173, %174, %175, %176, %177, %178 in 0 : vector<1x4x64xf32>, vector<1x4x64xf32>, vector<1x4x64xf32>, vector<1x4x64xf32>, vector<1x4x64xf32>, vector<1x4x64xf32>, vector<1x4x64xf32>, vector<1x4x64xf32>, vector<1x4x64xf32> -> vector<9x4x64xf32>
    %180 = vector.shape_cast %179 : vector<9x4x64xf32> to vector<36x64xf32>
    %181 = arith.truncf %180 : vector<36x64xf32> to vector<36x64xbf16>
    %cst_65 = arith.constant dense<0.000000e+00> : vector<16x64xf32>
    %182 = tpu.matmul %1, %181, %cst_65 {dimension_numbers = #tpu.dot_dimension_numbers<[1], [0], [0], [1], [0, 0, 1, 1], [], []>} : vector<16x36xbf16>, vector<36x64xbf16>, vector<16x64xf32> -> vector<16x64xf32>
    %183 = vector.broadcast %2 : vector<16x1xf32> to vector<16x64xf32>
    %184 = arith.addf %182, %183 : vector<16x64xf32>
    %cst_66 = arith.constant dense<0.000000e+00> : vector<16xf32>
    %185 = vector.multi_reduction <add>, %184, %cst_66 [1] : vector<16x64xf32> to vector<16xf32>
    %186 = vector.shape_cast %185 : vector<16xf32> to vector<16x1xf32>
    %cst_67 = arith.constant 6.400000e+01 : f32
    %187 = vector.broadcast %cst_67 : f32 to vector<16x1xf32>
    %188 = arith.divf %186, %187 : vector<16x1xf32>
    %189 = vector.broadcast %188 : vector<16x1xf32> to vector<16x64xf32>
    %190 = arith.subf %184, %189 : vector<16x64xf32>
    %191 = arith.mulf %190, %190 : vector<16x64xf32>
    %cst_68 = arith.constant dense<0.000000e+00> : vector<16xf32>
    %192 = vector.multi_reduction <add>, %191, %cst_68 [1] : vector<16x64xf32> to vector<16xf32>
    %193 = vector.shape_cast %192 : vector<16xf32> to vector<16x1xf32>
    %cst_69 = arith.constant 6.400000e+01 : f32
    %194 = vector.broadcast %cst_69 : f32 to vector<16x1xf32>
    %195 = arith.divf %193, %194 : vector<16x1xf32>
    %cst_70 = arith.constant 9.99999974E-6 : f32
    %196 = vector.broadcast %cst_70 : f32 to vector<16x1xf32>
    %197 = arith.addf %195, %196 : vector<16x1xf32>
    %198 = math.rsqrt %197 : vector<16x1xf32>
    %199 = vector.broadcast %198 : vector<16x1xf32> to vector<16x64xf32>
    %200 = arith.mulf %190, %199 : vector<16x64xf32>
    %201 = vector.broadcast %7 : vector<16x1xf32> to vector<16x64xf32>
    %202 = arith.mulf %200, %201 : vector<16x64xf32>
    %203 = vector.broadcast %8 : vector<16x1xf32> to vector<16x64xf32>
    %204 = arith.addf %202, %203 : vector<16x64xf32>
    %cst_71 = arith.constant 0.000000e+00 : f32
    %205 = vector.broadcast %cst_71 : f32 to vector<16x64xf32>
    %206 = arith.cmpf oge, %204, %205 : vector<16x64xf32>
    %cst_72 = arith.constant 2.000000e-01 : f32
    %207 = vector.broadcast %cst_72 : f32 to vector<16x64xf32>
    %208 = arith.mulf %207, %204 : vector<16x64xf32>
    %209 = arith.select %206, %204, %208 : vector<16x64xi1>, vector<16x64xf32>
    %c9_i32_73 = arith.constant 9 : i32
    %210 = tpu.dynamic_rotate %209 by %c9_i32_73 dim 1 : vector<16x64xf32>, i32 -> vector<16x64xf32>
    %211 = vector.broadcast %11 : vector<1x64xf32> to vector<16x64xf32>
    %212 = arith.mulf %210, %211 : vector<16x64xf32>
    %c8_i32_74 = arith.constant 8 : i32
    %213 = tpu.dynamic_rotate %209 by %c8_i32_74 dim 1 : vector<16x64xf32>, i32 -> vector<16x64xf32>
    %214 = vector.broadcast %13 : vector<1x64xf32> to vector<16x64xf32>
    %215 = arith.mulf %213, %214 : vector<16x64xf32>
    %c7_i32_75 = arith.constant 7 : i32
    %216 = tpu.dynamic_rotate %209 by %c7_i32_75 dim 1 : vector<16x64xf32>, i32 -> vector<16x64xf32>
    %217 = vector.broadcast %15 : vector<1x64xf32> to vector<16x64xf32>
    %218 = arith.mulf %216, %217 : vector<16x64xf32>
    %c1_i32_76 = arith.constant 1 : i32
    %219 = tpu.dynamic_rotate %209 by %c1_i32_76 dim 1 : vector<16x64xf32>, i32 -> vector<16x64xf32>
    %220 = vector.broadcast %17 : vector<1x64xf32> to vector<16x64xf32>
    %221 = arith.mulf %219, %220 : vector<16x64xf32>
    %c63_i32_77 = arith.constant 63 : i32
    %222 = tpu.dynamic_rotate %209 by %c63_i32_77 dim 1 : vector<16x64xf32>, i32 -> vector<16x64xf32>
    %223 = vector.broadcast %19 : vector<1x64xf32> to vector<16x64xf32>
    %224 = arith.mulf %222, %223 : vector<16x64xf32>
    %c57_i32_78 = arith.constant 57 : i32
    %225 = tpu.dynamic_rotate %209 by %c57_i32_78 dim 1 : vector<16x64xf32>, i32 -> vector<16x64xf32>
    %226 = vector.broadcast %21 : vector<1x64xf32> to vector<16x64xf32>
    %227 = arith.mulf %225, %226 : vector<16x64xf32>
    %c56_i32_79 = arith.constant 56 : i32
    %228 = tpu.dynamic_rotate %209 by %c56_i32_79 dim 1 : vector<16x64xf32>, i32 -> vector<16x64xf32>
    %229 = vector.broadcast %23 : vector<1x64xf32> to vector<16x64xf32>
    %230 = arith.mulf %228, %229 : vector<16x64xf32>
    %c55_i32_80 = arith.constant 55 : i32
    %231 = tpu.dynamic_rotate %209 by %c55_i32_80 dim 1 : vector<16x64xf32>, i32 -> vector<16x64xf32>
    %232 = vector.broadcast %25 : vector<1x64xf32> to vector<16x64xf32>
    %233 = arith.mulf %231, %232 : vector<16x64xf32>
    %234 = vector.shape_cast %212 : vector<16x64xf32> to vector<1x16x64xf32>
    %235 = vector.shape_cast %215 : vector<16x64xf32> to vector<1x16x64xf32>
    %236 = vector.shape_cast %218 : vector<16x64xf32> to vector<1x16x64xf32>
    %237 = vector.shape_cast %221 : vector<16x64xf32> to vector<1x16x64xf32>
    %238 = vector.shape_cast %209 : vector<16x64xf32> to vector<1x16x64xf32>
    %239 = vector.shape_cast %224 : vector<16x64xf32> to vector<1x16x64xf32>
    %240 = vector.shape_cast %227 : vector<16x64xf32> to vector<1x16x64xf32>
    %241 = vector.shape_cast %230 : vector<16x64xf32> to vector<1x16x64xf32>
    %242 = vector.shape_cast %233 : vector<16x64xf32> to vector<1x16x64xf32>
    %243 = tpu.concatenate %234, %235, %236, %237, %238, %239, %240, %241, %242 in 0 : vector<1x16x64xf32>, vector<1x16x64xf32>, vector<1x16x64xf32>, vector<1x16x64xf32>, vector<1x16x64xf32>, vector<1x16x64xf32>, vector<1x16x64xf32>, vector<1x16x64xf32>, vector<1x16x64xf32> -> vector<9x16x64xf32>
    %244 = vector.shape_cast %243 : vector<9x16x64xf32> to vector<144x64xf32>
    %245 = arith.truncf %244 : vector<144x64xf32> to vector<144x64xbf16>
    %cst_81 = arith.constant dense<0.000000e+00> : vector<16x64xf32>
    %246 = tpu.matmul %3, %245, %cst_81 {dimension_numbers = #tpu.dot_dimension_numbers<[1], [0], [0], [1], [0, 0, 1, 1], [], []>} : vector<16x144xbf16>, vector<144x64xbf16>, vector<16x64xf32> -> vector<16x64xf32>
    %247 = vector.broadcast %4 : vector<16x1xf32> to vector<16x64xf32>
    %248 = arith.addf %246, %247 : vector<16x64xf32>
    %249 = arith.truncf %40 : vector<4x64xf32> to vector<4x64xbf16>
    %cst_82 = arith.constant dense<0.000000e+00> : vector<16x64xf32>
    %250 = tpu.matmul %9, %249, %cst_82 {dimension_numbers = #tpu.dot_dimension_numbers<[1], [0], [0], [1], [0, 0, 1, 1], [], []>} : vector<16x4xbf16>, vector<4x64xbf16>, vector<16x64xf32> -> vector<16x64xf32>
    %251 = arith.addf %248, %250 : vector<16x64xf32>
    %cst_83 = arith.constant 0.707106769 : f32
    %252 = vector.broadcast %cst_83 : f32 to vector<16x64xf32>
    %253 = arith.mulf %251, %252 : vector<16x64xf32>
    %c0_84 = arith.constant 0 : index
    %c0_85 = arith.constant 0 : index
    %c0_86 = arith.constant 0 : index
    %254 = vector.load %arg12[%c0_84, %c0_85, %c0_86] : memref<1x16x64xf32, #tpu.memory_space<vmem>>, vector<1x16x64xf32>
    %255 = vector.shape_cast %254 : vector<1x16x64xf32> to vector<16x64xf32>
    %256 = vector.shape_cast %253 : vector<16x64xf32> to vector<1x16x64xf32>
    tpu.vector_store %arg12[%c0_84, %c0_85, %c0_86], %256 {strides = array<i32>} : memref<1x16x64xf32, #tpu.memory_space<vmem>>, vector<1x16x64xf32>,
    return
  }
  func.func @transform_0(%arg0: i32) -> (i32, i32, i32, i32) {
    %c0_i32 = arith.constant 0 : i32
    %c0_i32_0 = arith.constant 0 : i32
    %c0_i32_1 = arith.constant 0 : i32
    %c0_i32_2 = arith.constant 0 : i32
    return %arg0, %c0_i32, %c0_i32_0, %c0_i32_1 : i32, i32, i32, i32
  }
  func.func @transform_1(%arg0: i32) -> (i32, i32, i32) {
    %c0_i32 = arith.constant 0 : i32
    %c0_i32_0 = arith.constant 0 : i32
    %c0_i32_1 = arith.constant 0 : i32
    %c0_i32_2 = arith.constant 0 : i32
    return %c0_i32, %c0_i32_0, %c0_i32_1 : i32, i32, i32
  }
  func.func @transform_2(%arg0: i32) -> (i32, i32) {
    %c0_i32 = arith.constant 0 : i32
    %c0_i32_0 = arith.constant 0 : i32
    %c0_i32_1 = arith.constant 0 : i32
    return %c0_i32, %c0_i32_0 : i32, i32
  }
  func.func @transform_3(%arg0: i32) -> (i32, i32) {
    %c0_i32 = arith.constant 0 : i32
    %c0_i32_0 = arith.constant 0 : i32
    %c0_i32_1 = arith.constant 0 : i32
    return %c0_i32, %c0_i32_0 : i32, i32
  }
  func.func @transform_4(%arg0: i32) -> (i32, i32) {
    %c0_i32 = arith.constant 0 : i32
    %c0_i32_0 = arith.constant 0 : i32
    %c0_i32_1 = arith.constant 0 : i32
    return %c0_i32, %c0_i32_0 : i32, i32
  }
  func.func @transform_5(%arg0: i32) -> (i32, i32) {
    %c0_i32 = arith.constant 0 : i32
    %c0_i32_0 = arith.constant 0 : i32
    %c0_i32_1 = arith.constant 0 : i32
    return %c0_i32, %c0_i32_0 : i32, i32
  }
  func.func @transform_6(%arg0: i32) -> (i32, i32) {
    %c0_i32 = arith.constant 0 : i32
    %c0_i32_0 = arith.constant 0 : i32
    %c0_i32_1 = arith.constant 0 : i32
    return %c0_i32, %c0_i32_0 : i32, i32
  }
  func.func @transform_7(%arg0: i32) -> (i32, i32) {
    %c0_i32 = arith.constant 0 : i32
    %c0_i32_0 = arith.constant 0 : i32
    %c0_i32_1 = arith.constant 0 : i32
    return %c0_i32, %c0_i32_0 : i32, i32
  }
  func.func @transform_8(%arg0: i32) -> (i32, i32) {
    %c0_i32 = arith.constant 0 : i32
    %c0_i32_0 = arith.constant 0 : i32
    %c0_i32_1 = arith.constant 0 : i32
    return %c0_i32, %c0_i32_0 : i32, i32
  }
  func.func @transform_9(%arg0: i32) -> (i32, i32) {
    %c0_i32 = arith.constant 0 : i32
    %c0_i32_0 = arith.constant 0 : i32
    %c0_i32_1 = arith.constant 0 : i32
    return %c0_i32, %c0_i32_0 : i32, i32
  }
  func.func @transform_10(%arg0: i32) -> (i32, i32) {
    %c0_i32 = arith.constant 0 : i32
    %c0_i32_0 = arith.constant 0 : i32
    %c0_i32_1 = arith.constant 0 : i32
    return %c0_i32, %c0_i32_0 : i32, i32
  }
  func.func @transform_11(%arg0: i32) -> (i32, i32, i32) {
    %c0_i32 = arith.constant 0 : i32
    %c0_i32_0 = arith.constant 0 : i32
    %c0_i32_1 = arith.constant 0 : i32
    return %arg0, %c0_i32, %c0_i32_0 : i32, i32, i32
  }
}

</mosaic_0001>

<bundles_post_ra>
// kernel: tpu_custom_call.1
= control target key start
LH: loop header
LB: loop body
LE: loop exit
PB: predicated region body
PF: predicated region fallthrough
CT: control target
= control target key end

     0   :  { %s1714_s0 = inlined_call_operand.vmem [shape: f32[2,4,4,64], index: 0, kind: input, shape index: {}]   ;;  %s1715_s1 = inlined_call_operand.vmem [shape: f32[8,1,64], index: 1, kind: input, shape index: {}]   ;;  %s1716_s2 = inlined_call_operand.vmem [shape: bf16[16,36], index: 2, kind: input, shape index: {}]   ;;  %s1717_s3 = inlined_call_operand.vmem [shape: f32[16,1], index: 3, kind: input, shape index: {}]   ;;  %s1718_s4 = inlined_call_operand.vmem [shape: bf16[16,144], index: 4, kind: input, shape index: {}]   ;;  %s1719_s5 = inlined_call_operand.vmem [shape: f32[16,1], index: 5, kind: input, shape index: {}]   ;;  %s1720_s6 = inlined_call_operand.vmem [shape: f32[4,1], index: 6, kind: input, shape index: {}]   ;;  %s1721_s7 = inlined_call_operand.vmem [shape: f32[4,1], index: 7, kind: input, shape index: {}]   ;;  %s1722_s8 = inlined_call_operand.vmem [shape: f32[16,1], index: 8, kind: input, shape index: {}]   ;;  %s1723_s9 = inlined_call_operand.vmem [shape: f32[16,1], index: 9, kind: input, shape index: {}]   ;;  %s1724_s10 = inlined_call_operand.vmem [shape: bf16[16,4], index: 10, kind: input, shape index: {}]   ;;  %s1725_s11 = inlined_call_operand.hbm [shape: f32[2,16,64], index: 11, kind: output, shape index: {}]  }
   0x1   :  { %1735 = sst [smem:[#allocation5_spill]] %s1714_s0 }
   0x2   :  { %16 = vsyncpa [#allocation3], 0 }
   0x3   :  { %18 = vsyncpa [#allocation3 + $0x1], 0  ;;  %s1408_s17 = smov 0   ;;  %s1410_s18 = smov 0  }
   0x4   :  { %s1412_s19 = smov 0   ;;  %s1414_s20 = smov 0  }
   0x5 LB: > { %s1429_s21 = sadd.s32 4294967295, %s1324_s20   ;;  %s1097_s22 = sadd.s32 4294967294, %s1324_s20   ;;  %s1324_s20 = sphi %s1414_s20, %s1749_s20   ;;  %s1320_s19 = sphi %s1412_s19, %s1748_s19   ;;  %s1316_s18 = sphi %s1410_s18, %s1747_s18   ;;  %s1312_s17 = sphi %s1408_s17, %s1746_s17  }
   0x6   : > { %s1433_s23 = sadd.s32 1, %s1324_s20   ;;  %s267_s24 = sadd.s32 1, %s1320_s19 }
   0x7   : > { %s264_s25 = ssub.s32 %s1324_s20, %s1433_s23  ;;  %p277_p0 = scmp.ne.s32.totalorder %s1320_s19, %s1316_s18 }
   0x8   : > { %p265_p1 = scmp.eq.s32.totalorder %s264_s25, 0  ;;  %p278_p2 = scmp.eq.s32.totalorder %s1429_s21, 1 }
   0x9   : > { %p283_p3 = scmp.ne.s32.totalorder %s1316_s18, %s1312_s17  ;;  %p284_p4 = scmp.eq.s32.totalorder %s1097_s22, 1 }
   0xa   : > { %s1444_s26 = scalar_select %p265_p1, %s1320_s19, %s267_s24  }
   0xb   : > { %p1446_p5 = por %p278_p2, %p277_p0  ;;  %p1450_p6 = por %p284_p4, %p283_p3 }
   0xc   : > { %p1100_p7 = scmp.ge.s32.totalorder %s1324_s20, 1  ;;  %p340_p8 = scmp.lt.s32.totalorder %s1324_s20, 3 }
   0xe   : > { %p341_p9 = pnand %p1100_p7, %p340_p8 }
   0xf   : > { %p380_p10 = scmp.lt.s32.totalorder (!%p341_p9), %s1429_s21, 1  ;;  %s1738_s0 = sld [smem:[#allocation5_spill]] (!%p341_p9) }
  0x10   : > { %344 = sbr.rel (%p341_p9) target bundleno = 2210 (0x8a2), region = 64  ;;  %s1726_s12 = smov (!%p341_p9), 64  }
  0x11   : > { %s1329_s15 = smov (!%p341_p9), 9   ;;  %s1330_s24 = smov (!%p341_p9), 1  }
  0x12   : > { %s1728_s13 = smov (!%p341_p9), 8   ;;  %s1333_s22 = smov (!%p341_p9), 56  }
  0x13   : > { %s1337_s16 = smov (!%p341_p9), 48   ;;  %s1340_s25 = smov (!%p341_p9), 47  }
  0x15   : > { %s381_s29 = scalar_select %p380_p10, %s1429_s21, 1  ;;  %vm422_vm0 = vcmask 519168   ;;  %v1326_v32 = vmov 0   ;;  %v403_v33 = vld [vmem:[%s1721_s7] sm:$0xf]  ;;  %vm512_vm5 = vcmask 1048064  }
  0x16   : > { %1211 = vset.pattern.permute.xlu0 %v1326_v32  ;;  %1212 = vset.pattern.permute.xlu1 %v1326_v32  ;;  %v402_v47 = vld [vmem:[%s1720_s6] sm:$0xf]  ;;  %vm1345_vm6 = vmmov 0   ;;  %vm658_vm7 = vcmask 1041408   ;;  %vm654_vm8 = vcmask 293888   ;;  %vm703_vm9 = vcmask 523264  }
  0x17   : > { %s1127_s30 = sshll.u32 %s381_s29, 4  ;;  %920 = vmatprep.subr.bf16.mxu1 %v1326_v32  ;;  %v1109_v60 = vld [vmem:[%s1715_s1 + $0x2] ss:$0 sm:$0xff]  ;;  %s1734_s29 = smov 120   ;;  %vm967_vm12 = vcmask 31744   ;;  %vm916_vm13 = vcmask 130048  }
  0x18   : > { %s384_s14 = scalar_lea.vmem %s1738_s0, %s1127_s30  ;;  %s1327_s30 = smov 57  }
  0x19   : > { %v1461_v0 = vld [vmem:[%s384_s14] sm:$0xf]  ;;  %v1463_v1 = vld [vmem:[%s384_s14 + $0x8] sm:$0xf]  ;;  %v1465_v2 = vld [vmem:[%s384_s14 + $0x4] sm:$0xf] }
  0x1a   : > { %v423_v3 = vsel %vm422_vm0, %v1461_v0, 0.0  ;;  %v434_v4 = vsel %vm422_vm0, %v1463_v1, 0.0  ;;  %v1471_v5 = vld [vmem:[%s384_s14 + $0xc] sm:$0xf]  ;;  %v429_v6 = vsel %vm422_vm0, %v1465_v2, 0.0  ;;  %s1739_s14 = smov 64  }
  0x1b   : > { %424 = vadd.xlane.f32.xlu0 %v423_v3  ;;  %435 = vadd.xlane.f32.xlu1 %v434_v4  ;;  %v439_v7 = vsel %vm422_vm0, %v1471_v5, 0.0  ;;  %s1334_s0 = smov 63  }
  0x1f   : > { %430 = vadd.xlane.f32.xlu0 %v429_v6  ;;  %440 = vadd.xlane.f32.xlu1 %v439_v7 }
  0xa4   : > { %v425_v8 = vpop.xlane.xlu0 %424  ;;  %v436_v9 = vpop.xlane.xlu1 %435 }
  0xa5   : > { %v427_v12 = vmul.f32 0.015625, %v425_v8  ;;  %v437_v14 = vmul.f32 0.015625, %v436_v9 }
  0xa8   : > { %v431_v10 = vpop.xlane.xlu0 %430  ;;  %v441_v11 = vpop.xlane.xlu1 %440 }
  0xa9   : > { %v432_v13 = vmul.f32 0.015625, %v431_v10  ;;  %v442_v16 = vmul.f32 0.015625, %v441_v11 }
  0xab   : > { %v433_v15 = vadd.f32 %v432_v13, %v427_v12  ;;  %v1114_v13 = vld [vmem:[%s1715_s1 + $0x7] ss:$0 sm:$0xff] }
  0xad   : > { %v438_v17 = vadd.f32 %v437_v14, %v433_v15  ;;  %v1111_v14 = vld [vmem:[%s1715_s1 + $0x4] ss:$0 sm:$0xff]  ;;  %v1112_v15 = vld [vmem:[%s1715_s1 + $0x5] ss:$0 sm:$0xff] }
  0xaf   : > { %v443_v18 = vadd.f32 %v442_v16, %v438_v17  ;;  %v1113_v16 = vld [vmem:[%s1715_s1 + $0x6] ss:$0 sm:$0xff] }
  0xb1   : > { %v444_v19 = vmul.f32 0.25, %v443_v18 }
  0xb3   : > { %v446_v20 = vsub.f32 %v1465_v2, %v444_v19  ;;  %v445_v21 = vsub.f32 %v1461_v0, %v444_v19  ;;  %v448_v22 = vsub.f32 %v1471_v5, %v444_v19  ;;  %v447_v23 = vsub.f32 %v1463_v1, %v444_v19  ;;  %v1108_v19 = vld [vmem:[%s1715_s1 + $0x1] ss:$0 sm:$0xff] }
  0xb5   : > { %v455_v24 = vmul.f32 %v446_v20, %v446_v20  ;;  %v449_v25 = vmul.f32 %v445_v21, %v445_v21  ;;  %v467_v28 = vmul.f32 %v448_v22, %v448_v22  ;;  %v461_v29 = vmul.f32 %v447_v23, %v447_v23 }
  0xb7   : > { %v456_v26 = vsel %vm422_vm0, %v455_v24, 0.0  ;;  %v450_v27 = vsel %vm422_vm0, %v449_v25, 0.0  ;;  %v468_v30 = vsel %vm422_vm0, %v467_v28, 0.0  ;;  %v462_v31 = vsel %vm422_vm0, %v461_v29, 0.0 }
  0xb8   : > { %457 = vadd.xlane.f32.xlu1 %v456_v26  ;;  %451 = vadd.xlane.f32.xlu0 %v450_v27 }
  0xbc   : > { %469 = vadd.xlane.f32.xlu1 %v468_v30  ;;  %463 = vadd.xlane.f32.xlu0 %v462_v31 }
  0xcd   : > { %485 = vperm.xlu1 %1212, %v403_v33  }
 0x141   : > { %v458_v34 = vpop.xlane.xlu1 %457  ;;  %v452_v35 = vpop.xlane.xlu0 %451 }
 0x142   : > { %v459_v36 = vmul.f32 0.015625, %v458_v34  ;;  %v453_v37 = vmul.f32 0.015625, %v452_v35 }
 0x144   : > { %v460_v40 = vadd.f32 %v459_v36, %v453_v37 }
 0x145   : > { %v470_v38 = vpop.xlane.xlu1 %469  ;;  %v464_v39 = vpop.xlane.xlu0 %463 }
 0x146   : > { %v465_v41 = vmul.f32 0.015625, %v464_v39  ;;  %v471_v42 = vmul.f32 0.015625, %v470_v38  ;;  %v1343_v39 = vmov 0.0  }
 0x147   : > { %1135 = vmatprep.subr.bf16.mxu0 %v1343_v39  ;;  %1141 = vmatprep.mubr.msk.bf16.mxu0 %vm1345_vm6, %v1343_v39 }
 0x148   : > { %v466_v43 = vadd.f32 %v465_v41, %v460_v40 }
 0x149   : > { %v486_v51 = vpop.permute.xlu1 %485 }
 0x14a   : > { %v472_v44 = vadd.f32 %v471_v42, %v466_v43 }
 0x14c   : > { %v473_v45 = vmul.f32 0.25, %v472_v44 }
 0x14e   : > { %v474_v46 = vadd.f32 1e-05, %v473_v45 }
 0x150   : > { %1258 = vrsqrt.f32 %v474_v46 }
 0x15d   : > { %v1259_v48 = vpop.eup %1258 }
 0x15e   : > { %v476_v49 = vmul.f32 %v1259_v48, %v402_v47 }
 0x160   : > { %479 = vperm.xlu0 %1211, %v476_v49  }
 0x164   : > { %542 = vrot.lane.b32.xlu0 %v1109_v60, %s1327_s30  ;;  %s1331_s30 = smov 7  }
 0x1db   : > { %v480_v50 = vpop.permute.xlu0 %479 }
 0x1dc   : > { %v482_v52 = vmul.f32 %v480_v50, %v445_v21  ;;  %v489_v53 = vmul.f32 %v480_v50, %v446_v20  ;;  %v491_v54 = vmul.f32 %v480_v50, %v447_v23  ;;  %v493_v55 = vmul.f32 %v480_v50, %v448_v22  ;;  %v1110_v20 = vld [vmem:[%s1715_s1 + $0x3] ss:$0 sm:$0xff]  ;;  %v1107_v21 = vld [vmem:[%s1715_s1] ss:$0 sm:$0xff] }
 0x1de   : > { %v488_v56 = vadd.f32 %v486_v51, %v482_v52  ;;  %v490_v57 = vadd.f32 %v489_v53, %v486_v51  ;;  %v492_v58 = vadd.f32 %v491_v54, %v486_v51  ;;  %v494_v59 = vadd.f32 %v493_v55, %v486_v51  ;;  %v396_v51 = vld [vmem:[%s1717_s3] sm:$0xff] }
 0x1df   : > { %v1535_v30 = vpop.permute.xlu0 %542 }
 0x1e0   : > { %vm495_vm1 = vcmp.ge.f32.partialorder %v488_v56, 0.0  ;;  %v496_v61 = vmul.f32 0.2, %v488_v56  ;;  %vm498_vm2 = vcmp.ge.f32.partialorder %v490_v57, 0.0  ;;  %v499_v62 = vmul.f32 0.2, %v490_v57 }
 0x1e1   : > { %vm501_vm3 = vcmp.ge.f32.partialorder %v492_v58, 0.0  ;;  %v502_v63 = vmul.f32 0.2, %v492_v58  ;;  %v505_v6 = vmul.f32 0.2, %v494_v59  ;;  %vm504_vm4 = vcmp.ge.f32.partialorder %v494_v59, 0.0 }
 0x1e2   : > { %v497_v3 = vsel %vm495_vm1, %v488_v56, %v496_v61  ;;  %v500_v4 = vsel %vm498_vm2, %v490_v57, %v499_v62 }
 0x1e3   : > { %v508_v7 = vadd.f32 %v500_v4, %v497_v3  ;;  %v503_v8 = vsel %vm501_vm3, %v492_v58, %v502_v63  ;;  %v506_v10 = vsel %vm504_vm4, %v494_v59, %v505_v6  ;;  %v397_v58 = vld [vmem:[%s1717_s3 + $0x8] sm:$0xff]  ;;  %v418_v59 = vadd.f32 %v1465_v2, %v1461_v0 }
 0x1e5   : > { %v509_v9 = vadd.f32 %v508_v7, %v503_v8  ;;  %v419_v62 = vadd.f32 %v1463_v1, %v418_v59  ;;  %v1253_v8 = vld [vmem:[%s1716_s2] sm:$0xff]  }
 0x1e7   : > { %v510_v11 = vadd.f32 %v509_v9, %v506_v10  ;;  %v420_v63 = vadd.f32 %v1471_v5, %v419_v62 }
 0x1e9   : > { %v511_v12 = vmul.f32 0.25, %v510_v11  ;;  %v421_v4 = vmul.f32 0.25, %v420_v63 }
 0x1eb   : > { %513 = vrot.lane.b32.xlu1 %v511_v12, %s1726_s12  ;;  %s1335_s12 = smov 55   ;;  %v961_v6 = vpack.c.bf16 %v421_v4, %v421_v4 }
 0x1ed   : > { %v972_v0 = vsel %vm658_vm7, %v961_v6, 0 }
 0x1ef   : > { %587 = vrot.lane.b32.xlu1 %v1114_v13, %s1329_s15  ;;  %s1730_s15 = smov 46  }
 0x1f3   : > { %560 = vrot.lane.b32.xlu1 %v1111_v14, %s1330_s24  ;;  %s1731_s24 = smov 126  }
 0x1f7   : > { %569 = vrot.lane.b32.xlu1 %v1112_v15, %s1331_s30  ;;  %s1732_s30 = smov 73  }
 0x1fb   : > { %578 = vrot.lane.b32.xlu1 %v1113_v16, %s1728_s13  ;;  %v404_v16 = vld [vmem:[%s1722_s8] sm:$0xff] }
 0x25d   : > { %v514_v17 = vpop.permute.xlu1 %513 }
 0x25e   : > { %v515_v18 = vsel %vm512_vm5, %v514_v17, %v511_v12  ;;  %v406_v17 = vld [vmem:[%s1723_s9] sm:$0xff] }
 0x25f   : > { %516 = vrot.lane.b32.xlu1 %v515_v18, %s1739_s14  ;;  %v407_v18 = vld [vmem:[%s1723_s9 + $0x8] sm:$0xff] }
 0x261   : > { %v1524_v22 = vpop.permute.xlu1 %587 }
 0x263   : > { %533 = vrot.lane.b32.xlu1 %v1108_v19, %s1333_s22  ;;  %s1338_s22 = smov 54  }
 0x265   : > { %v1526_v23 = vpop.permute.xlu1 %560 }
 0x267   : > { %551 = vrot.lane.b32.xlu1 %v1110_v20, %s1334_s0  ;;  %s1729_s0 = smov 127  }
 0x269   : > { %v1528_v24 = vpop.permute.xlu1 %569 }
 0x26b   : > { %601 = vrot.lane.b32.xlu1 %v511_v12, %s1335_s12 }
 0x26d   : > { %v1530_v25 = vpop.permute.xlu1 %578 }
 0x26f   : > { %524 = vrot.lane.b32.xlu1 %v1107_v21, %s1335_s12 }
 0x2d1   : > { %v517_v26 = vpop.permute.xlu1 %516 }
 0x2d2   : > { %v518_v27 = vsel %vm512_vm5, %v517_v26, %v511_v12 }
 0x2d3   : > { %v590_v28 = vmul.f32 %v1524_v22, %v518_v27  ;;  %v572_v29 = vmul.f32 %v1528_v24, %v518_v27  ;;  %v545_v31 = vmul.f32 %v1535_v30, %v518_v27  ;;  %v563_v33 = vmul.f32 %v1526_v23, %v518_v27 }
 0x2d4   : > { %v581_v35 = vmul.f32 %v1530_v25, %v518_v27 }
 0x2d5   : > { %613 = vrot.lane.b32.xlu0 %v590_v28, %s1730_s15  ;;  %607 = vrot.lane.b32.xlu1 %v572_v29, %s1337_s16  ;;  %v1543_v34 = vpop.permute.xlu1 %533 }
 0x2d6   : > { %v536_v36 = vmul.f32 %v1543_v34, %v518_v27 }
 0x2d9   : > { %604 = vrot.lane.b32.xlu0 %v563_v33, %s1338_s22  ;;  %595 = vrot.lane.b32.xlu1 %v545_v31, %s1731_s24  ;;  %v1548_v37 = vpop.permute.xlu1 %551 }
 0x2da   : > { %v554_v38 = vmul.f32 %v1548_v37, %v518_v27 }
 0x2dd   : > { %610 = vrot.lane.b32.xlu0 %v581_v35, %s1340_s25  ;;  %v602_v40 = vpop.permute.xlu1 %601 }
 0x2e1   : > { %592 = vrot.lane.b32.xlu0 %v536_v36, %s1729_s0  ;;  %v1554_v43 = vpop.permute.xlu1 %524  ;;  %v405_v36 = vld [vmem:[%s1722_s8 + $0x8] sm:$0xff] }
 0x2e2   : > { %v527_v52 = vmul.f32 %v1554_v43, %v518_v27 }
 0x2e5   : > { %598 = vrot.lane.b32.xlu0 %v554_v38, %s1734_s29 }
 0x347   : > { %v614_v41 = vpop.permute.xlu0 %613  ;;  %v608_v45 = vpop.permute.xlu1 %607 }
 0x348   : > { %v627_v42 = vpack.c.bf16 %v614_v41, %v614_v41 }
 0x34a   : > { %650 = vrot.lane.b32.xlu1 %v627_v42, %s1732_s30 }
 0x34b   : > { %v605_v44 = vpop.permute.xlu0 %604  ;;  %v596_v53 = vpop.permute.xlu1 %595 }
 0x34c   : > { %v619_v47 = vcombine.low %v602_v40, %v605_v44 }
 0x34f   : > { %v611_v46 = vpop.permute.xlu0 %610 }
 0x350   : > { %v620_v48 = vcombine.low %v608_v45, %v611_v46 }
 0x352   : > { %v626_v49 = vpack.c.bf16 %v620_v48, %v619_v47 }
 0x353   : > { %v593_v50 = vpop.permute.xlu0 %592 }
 0x354   : > { %648 = vrot.lane.b32.xlu0 %v626_v49, %s1732_s30  ;;  %v617_v55 = vcombine.low %v527_v52, %v593_v50 }
 0x357   : > { %v599_v54 = vpop.permute.xlu0 %598 }
 0x358   : > { %v618_v56 = vcombine.low %v596_v53, %v599_v54  ;;  %630 = vperm.xlu0 %1211, %v396_v51  }
 0x35a   : > { %v625_v57 = vpack.c.bf16 %v618_v56, %v617_v55 }
 0x35c   : > { %646 = vrot.lane.b32.xlu1 %v625_v57, %s1732_s30  ;;  %s1128_s30 = sshll.u32 %s1429_s21, 8 }
 0x360   : > { %635 = vperm.xlu1 %1212, %v397_v58  }
 0x3bc   : > { %v651_v60 = vpop.permute.xlu1 %650 }
 0x3bd   : > { %v660_v61 = vsel %vm658_vm7, %v651_v60, 0 }
 0x3be   : > { %1136 = vmatpush3.bf16.msra.mxu0 %v660_v61 }
 0x3bf   : > { %1137 = vmatprep.subr.bf16.mxu0 %v1343_v39 }
 0x3c6   : > { %v649_v3 = vpop.permute.xlu0 %648 }
 0x3c7   : > { %1138 = vmatpush3.bf16.msra.mxu0 %v649_v3 }
 0x3c8   : > { %1139 = vmatprep.subr.bf16.mxu0 %v1343_v39 }
 0x3ce   : > { %v647_v7 = vpop.permute.xlu1 %646 }
 0x3cf   : > { %1140 = vmatpush3.bf16.msra.mxu0 %v647_v7 }
 0x3d0   : > { %1145 = vmatprep.subr.bf16.mxu0 %v1343_v39 }
 0x3d2   : > { %1142 = vmatmul.mubr.msk.bf16.vlgmr.msra.gmra.mxu0 %vm654_vm8, %v1253_v8 }
 0x3d3   : > { %1146 = vmatpush3.bf16.msra.mxu0 %v972_v0  ;;  %1147 = vmatprep.mubr.msk.bf16.mxu0 %vm1345_vm6, %v1343_v39  ;;  %v631_v1 = vpop.permute.xlu0 %630 }
 0x3db   : > { %v636_v11 = vpop.permute.xlu1 %635 }
 0x492   : > { %v696_v2 = vpop.f32.mrf.mxu0 }
 0x493   : > { %v697_v5 = vadd.f32 %v696_v2, %v631_v1 }
 0x494   : > { %v1143_v9 = vpop.f32.mrf.mxu0 }
 0x495   : > { %v704_v10 = vsel %vm703_vm9, %v697_v5, 0.0 }
 0x496   : > { %v699_v12 = vpop.f32.mrf.mxu0  ;;  %705 = vadd.xlane.f32.xlu0 %v704_v10 }
 0x497   : > { %v700_v13 = vadd.f32 %v699_v12, %v636_v11 }
 0x498   : > { %v1144_v14 = vpop.f32.mrf.mxu0 }
 0x499   : > { %v707_v15 = vsel %vm703_vm9, %v700_v13, 0.0 }
 0x49a   : > { %708 = vadd.xlane.f32.xlu1 %v707_v15 }
 0x4ab   : > { %732 = vperm.xlu1 %1212, %v404_v16  }
 0x4af   : > { %744 = vperm.xlu1 %1212, %v406_v17  }
 0x4b3   : > { %749 = vperm.xlu1 %1212, %v407_v18  }
 0x51f   : > { %v706_v19 = vpop.xlane.xlu0 %705 }
 0x520   : > { %v710_v20 = vmul.f32 0.015625, %v706_v19 }
 0x522   : > { %v712_v21 = vsub.f32 %v697_v5, %v710_v20 }
 0x523   : > { %v709_v26 = vpop.xlane.xlu1 %708 }
 0x524   : > { %v711_v27 = vmul.f32 0.015625, %v709_v26  ;;  %v714_v28 = vmul.f32 %v712_v21, %v712_v21 }
 0x526   : > { %v713_v29 = vsub.f32 %v700_v13, %v711_v27  ;;  %v716_v31 = vsel %vm703_vm9, %v714_v28, 0.0 }
 0x527   : > { %717 = vadd.xlane.f32.xlu0 %v716_v31  ;;  %v733_v45 = vpop.permute.xlu1 %732 }
 0x528   : > { %v715_v33 = vmul.f32 %v713_v29, %v713_v29 }
 0x52a   : > { %v719_v35 = vsel %vm703_vm9, %v715_v33, 0.0 }
 0x52b   : > { %720 = vadd.xlane.f32.xlu0 %v719_v35  ;;  %v745_v48 = vpop.permute.xlu1 %744 }
 0x52f   : > { %v750_v56 = vpop.permute.xlu1 %749 }
 0x541   : > { %737 = vperm.xlu0 %1211, %v405_v36  }
 0x5b0   : > { %v718_v38 = vpop.xlane.xlu0 %717 }
 0x5b1   : > { %v722_v39 = vmul.f32 0.015625, %v718_v38 }
 0x5b3   : > { %v724_v40 = vadd.f32 1e-05, %v722_v39 }
 0x5b4   : > { %v721_v41 = vpop.xlane.xlu0 %720 }
 0x5b5   : > { %1260 = vrsqrt.f32 %v724_v40  ;;  %v723_v42 = vmul.f32 0.015625, %v721_v41 }
 0x5b7   : > { %v725_v44 = vadd.f32 1e-05, %v723_v42 }
 0x5b9   : > { %1262 = vrsqrt.f32 %v725_v44 }
 0x5bc   : > { %v738_v53 = vpop.permute.xlu0 %737 }
 0x5c2   : > { %v1261_v46 = vpop.eup %1260 }
 0x5c3   : > { %v728_v47 = vmul.f32 %v1261_v46, %v712_v21 }
 0x5c5   : > { %v740_v49 = vmul.f32 %v733_v45, %v728_v47 }
 0x5c6   : > { %v1263_v50 = vpop.eup %1262 }
 0x5c7   : > { %v729_v51 = vmul.f32 %v1263_v50, %v713_v29  ;;  %v752_v52 = vadd.f32 %v745_v48, %v740_v49 }
 0x5c9   : > { %v741_v54 = vmul.f32 %v738_v53, %v729_v51  ;;  %vm754_vm10 = vcmp.ge.f32.partialorder %v752_v52, 0.0  ;;  %v756_v55 = vmul.f32 0.2, %v752_v52 }
 0x5cb   : > { %v753_v57 = vadd.f32 %v750_v56, %v741_v54  ;;  %v758_v58 = vsel %vm754_vm10, %v752_v52, %v756_v55 }
 0x5cc   : > { %760 = vrot.lane.b32.xlu0 %v758_v58, %s1739_s14 }
 0x5cd   : > { %v757_v59 = vmul.f32 0.2, %v753_v57  ;;  %vm755_vm11 = vcmp.ge.f32.partialorder %v753_v57, 0.0 }
 0x5cf   : > { %v759_v60 = vsel %vm755_vm11, %v753_v57, %v757_v59 }
 0x5d0   : > { %763 = vrot.lane.b32.xlu1 %v759_v60, %s1739_s14 }
 0x63e   : > { %v761_v61 = vpop.permute.xlu0 %760 }
 0x63f   : > { %v762_v62 = vsel %vm512_vm5, %v761_v61, %v758_v58 }
 0x640   : > { %766 = vrot.lane.b32.xlu0 %v762_v62, %s1739_s14  ;;  %v400_v62 = vld [vmem:[%s1719_s5] sm:$0xff] }
 0x642   : > { %v764_v63 = vpop.permute.xlu1 %763 }
 0x643   : > { %v765_v3 = vsel %vm512_vm5, %v764_v63, %v759_v60 }
 0x644   : > { %768 = vrot.lane.b32.xlu1 %v765_v3, %s1739_s14  ;;  %s1740_s14 = smov 120   ;;  %v1254_v3 = vld [vmem:[%s1724_s10] sm:$0xff]  }
 0x645   : > { %1148 = vmatmul.mubr.msk.bf16.vlgmr.msra.gmra.mxu0 %vm967_vm12, %v1254_v3 }
 0x6b2   : > { %v767_v4 = vpop.permute.xlu0 %766 }
 0x6b3   : > { %v770_v6 = vsel %vm512_vm5, %v767_v4, %v758_v58  ;;  %v401_v4 = vld [vmem:[%s1719_s5 + $0x8] sm:$0xff] }
 0x6b4   : > { %v784_v0 = vmul.f32 %v770_v6, %v1530_v25  ;;  %v782_v2 = vmul.f32 %v770_v6, %v1528_v24  ;;  %v1605_v9 = vmul.f32 %v770_v6, %v1554_v43  ;;  %v778_v17 = vmul.f32 %v770_v6, %v1548_v37 }
 0x6b5   : > { %v776_v18 = vmul.f32 %v770_v6, %v1535_v30  ;;  %v786_v26 = vmul.f32 %v770_v6, %v1524_v22  ;;  %v774_v27 = vmul.f32 %v770_v6, %v1543_v34 }
 0x6b6   : > { %v769_v7 = vpop.permute.xlu1 %768 }
 0x6b7   : > { %v771_v8 = vsel %vm512_vm5, %v769_v7, %v759_v60 }
 0x6b8   : > { %v785_v1 = vmul.f32 %v771_v8, %v1530_v25  ;;  %v783_v5 = vmul.f32 %v771_v8, %v1528_v24  ;;  %v1608_v10 = vmul.f32 %v771_v8, %v1554_v43  ;;  %v781_v13 = vmul.f32 %v771_v8, %v1526_v23 }
 0x6b9   : > { %v780_v25 = vmul.f32 %v770_v6, %v1526_v23  ;;  %v1228_v24 = vpack.i.bf16 %v759_v60, %v758_v58  ;;  %v779_v16 = vmul.f32 %v771_v8, %v1548_v37  ;;  %v777_v43 = vmul.f32 %v771_v8, %v1535_v30  ;;  %v1257_v6 = vld [vmem:[%s1718_s4 + $0x4] ss:$8 sps:$4 sm:$0xff]  }
 0x6ba   : > { %v1213_v11 = vpack.i.bf16 %v785_v1, %v784_v0  ;;  %v1218_v12 = vpack.i.bf16 %v783_v5, %v782_v2  ;;  %v852_v14 = vpack.c.bf16 %v1608_v10, %v1605_v9  ;;  %v787_v21 = vmul.f32 %v771_v8, %v1524_v22  ;;  %1119 = vmatprep.mubr.msk.bf16.mxu1 %vm916_vm13, %v1257_v6 }
 0x6bb   : > { %v1223_v15 = vpack.i.bf16 %v781_v13, %v780_v25  ;;  %v1233_v19 = vpack.i.bf16 %v779_v16, %v778_v17  ;;  %v1238_v20 = vpack.i.bf16 %v777_v43, %v776_v18  ;;  %v775_v23 = vmul.f32 %v771_v8, %v1543_v34 }
 0x6bc   : > { %1214 = vrot.lane.b32.xlu0 %v1213_v11, %s1340_s25  ;;  %1219 = vrot.lane.b32.xlu1 %v1218_v12, %s1337_s16  ;;  %s1741_s16 = smov 126   ;;  %v1248_v28 = vpack.i.bf16 %v787_v21, %v786_v26  ;;  %s1744_s25 = smov 73   ;;  %v1255_v12 = vld [vmem:[%s1718_s4] ss:$8 sps:$4 sm:$0xff]  }
 0x6bd   : > { %v1243_v29 = vpack.i.bf16 %v775_v23, %v774_v27 }
 0x6c0   : > { %1229 = vrot.lane.b32.xlu1 %v1228_v24, %s1335_s12  ;;  %1224 = vrot.lane.b32.xlu0 %v1223_v15, %s1338_s22  ;;  %s1742_s12 = smov 46   ;;  %s1743_s22 = smov 127  }
 0x6c4   : > { %1234 = vrot.lane.b32.xlu0 %v1233_v19, %s1740_s14  ;;  %1239 = vrot.lane.b32.xlu1 %v1238_v20, %s1741_s16  ;;  %s1668_s14 = scalar_lea.hbm %s1725_s11, %s1128_s30 }
 0x6c8   : > { %1249 = vrot.lane.b32.xlu1 %v1248_v28, %s1742_s12  ;;  %1244 = vrot.lane.b32.xlu0 %v1243_v29, %s1743_s22  ;;  %s1346_s12 = smov [#allocation2]  }
 0x6c9   : > { %s1268_s22 = sshll.u32 %s1346_s12, 4  ;;  %s1269_s22 = int_to_ptr.vmem [resolvable:$false] %s1268_s22 }
 0x705   : > { %v1008_v13 = vpop.f32.mrf.mxu0 }
 0x72e   : > { %v1215_v30 = vpop.permute.xlu0 %1214  ;;  %v1220_v37 = vpop.permute.xlu1 %1219 }
 0x72f   : > { %v1217_v31 = vunpack.i.h.bf16 %v1215_v30  ;;  %v1216_v33 = vunpack.i.l.bf16 %v1215_v30  ;;  %v1222_v35 = vunpack.i.h.bf16 %v1220_v37  ;;  %v1221_v36 = vunpack.i.l.bf16 %v1220_v37 }
 0x731   : > { %v859_v38 = vpack.c.bf16 %v1217_v31, %v1216_v33  ;;  %v858_v39 = vpack.c.bf16 %v1222_v35, %v1221_v36 }
 0x732   : > { %v1230_v40 = vpop.permute.xlu1 %1229  ;;  %v1225_v41 = vpop.permute.xlu0 %1224 }
 0x733   : > { %v1232_v42 = vunpack.i.h.bf16 %v1230_v40  ;;  %v1231_v22 = vunpack.i.l.bf16 %v1230_v40  ;;  %v1227_v44 = vunpack.i.h.bf16 %v1225_v41  ;;  %v1226_v34 = vunpack.i.l.bf16 %v1225_v41  ;;  %901 = vrot.lane.b32.xlu1 %v858_v39, %s1744_s25  ;;  %903 = vrot.lane.b32.xlu0 %v859_v38, %s1744_s25 }
 0x735   : > { %v856_v45 = vpack.c.bf16 %v1232_v42, %v1231_v22  ;;  %v857_v46 = vpack.c.bf16 %v1227_v44, %v1226_v34 }
 0x736   : > { %v1235_v47 = vpop.permute.xlu0 %1234  ;;  %v1240_v48 = vpop.permute.xlu1 %1239 }
 0x737   : > { %v1237_v49 = vunpack.i.h.bf16 %v1235_v47  ;;  %v1236_v50 = vunpack.i.l.bf16 %v1235_v47  ;;  %v1242_v51 = vunpack.i.h.bf16 %v1240_v48  ;;  %v1241_v52 = vunpack.i.l.bf16 %v1240_v48  ;;  %897 = vrot.lane.b32.xlu1 %v856_v45, %s1744_s25  ;;  %899 = vrot.lane.b32.xlu0 %v857_v46, %s1744_s25 }
 0x739   : > { %v855_v53 = vpack.c.bf16 %v1237_v49, %v1236_v50  ;;  %v854_v54 = vpack.c.bf16 %v1242_v51, %v1241_v52 }
 0x73a   : > { %v1250_v55 = vpop.permute.xlu1 %1249  ;;  %v1245_v56 = vpop.permute.xlu0 %1244 }
 0x73b   : > { %v1247_v57 = vunpack.i.h.bf16 %v1245_v56  ;;  %v1246_v58 = vunpack.i.l.bf16 %v1245_v56  ;;  %893 = vrot.lane.b32.xlu1 %v854_v54, %s1744_s25  ;;  %895 = vrot.lane.b32.xlu0 %v855_v53, %s1744_s25  ;;  %v1252_v59 = vunpack.i.h.bf16 %v1250_v55  ;;  %v1251_v60 = vunpack.i.l.bf16 %v1250_v55 }
 0x73d   : > { %v853_v61 = vpack.c.bf16 %v1247_v57, %v1246_v58  ;;  %v860_v63 = vpack.c.bf16 %v1252_v59, %v1251_v60 }
 0x73f   : > { %891 = vrot.lane.b32.xlu0 %v853_v61, %s1744_s25  ;;  %889 = vrot.lane.b32.xlu1 %v852_v14, %s1744_s25  ;;  %v1149_v14 = vpop.f32.mrf.mxu0 }
 0x741   : > { %v1011_v25 = vpop.f32.mrf.mxu0 }
 0x743   : > { %905 = vrot.lane.b32.xlu0 %v860_v63, %s1744_s25  ;;  %863 = vperm.xlu1 %1212, %v400_v62   ;;  %v1150_v24 = vpop.f32.mrf.mxu0  ;;  %s377_s25 = sand.u32 1, %s1316_s18  }
 0x744   : > { %s1101_s29 = sshll.u32 %s377_s25, 4  ;;  %s1673_s21 = scalar_lea.sflag [#allocation3], %s377_s25 }
 0x745   : > { %s379_s13 = scalar_lea.vmem [#allocation2], %s1101_s29  ;;  %s1270_s29 = scalar_lea.vmem %s1269_s22, 512 }
 0x746   : > { %s1035_s15 = sshll.u32 %s379_s13, 4  ;;  %s1670_s15 = int_to_ptr.vmem [resolvable:$true] %s1035_s15 }
 0x747   : > { %868 = vperm.xlu0 %1211, %v401_v4   ;;  %s1264_s16 = scalar_lea.vmem %s1670_s15, 256  ;;  %p1271_p0 = scmp.lt.s32.totalorder %s1670_s15, %s1269_s22 }
 0x748   : > { %p1265_p11 = scmp.ne.s32.totalorder %s1670_s15, %s1264_s16  ;;  %p1272_p1 = scmp.lt.s32.totalorder %s1270_s29, %s1264_s16 }
 0x74a   : > { %p1266_p12 = pnand %p1265_p11, %p1446_p5  ;;  %p1273_p2 = por %p1272_p1, %p1271_p0 }
 0x74c   : > { %p1267_p13 = pneg %p1266_p12 }
 0x74e   : > { %p1274_p3 = pnand %p1273_p2, %p1267_p13 }
 0x7a5   : > { %v904_v7 = vpop.permute.xlu0 %903  ;;  %v902_v8 = vpop.permute.xlu1 %901 }
 0x7a6   : > { %921 = vmatpush1.bf16.msra.mxu1 %v904_v7 }
 0x7a7   : > { %922 = vmatprep.subr.bf16.mxu1 %v1326_v32 }
 0x7a9   : > { %v900_v0 = vpop.permute.xlu0 %899  ;;  %v898_v1 = vpop.permute.xlu1 %897 }
 0x7aa   : > { %923 = vmatpush1.bf16.msra.mxu1 %v902_v8 }
 0x7ab   : > { %924 = vmatprep.subr.bf16.mxu1 %v1326_v32 }
 0x7ad   : > { %v896_v2 = vpop.permute.xlu0 %895  ;;  %v894_v5 = vpop.permute.xlu1 %893 }
 0x7ae   : > { %925 = vmatpush1.bf16.msra.mxu1 %v900_v0 }
 0x7af   : > { %926 = vmatprep.subr.bf16.mxu1 %v1326_v32 }
 0x7b1   : > { %v892_v9 = vpop.permute.xlu0 %891  ;;  %v890_v10 = vpop.permute.xlu1 %889 }
 0x7b2   : > { %927 = vmatpush1.bf16.msra.mxu1 %v898_v1 }
 0x7b3   : > { %928 = vmatprep.subr.bf16.mxu1 %v1326_v32 }
 0x7b5   : > { %v906_v11 = vpop.permute.xlu0 %905 }
 0x7b6   : > { %929 = vmatpush1.bf16.msra.mxu1 %v896_v2 }
 0x7b7   : > { %930 = vmatprep.subr.bf16.mxu1 %v1326_v32 }
 0x7ba   : > { %931 = vmatpush1.bf16.msra.mxu1 %v894_v5 }
 0x7bb   : > { %932 = vmatprep.subr.bf16.mxu1 %v1326_v32 }
 0x7be   : > { %933 = vmatpush1.bf16.msra.mxu1 %v892_v9  ;;  %v864_v15 = vpop.permute.xlu1 %863 }
 0x7bf   : > { %934 = vmatprep.subr.bf16.mxu1 %v1326_v32 }
 0x7c2   : > { %935 = vmatpush1.bf16.msra.mxu1 %v890_v10 }
 0x7c3   : > { %950 = vmatprep.subr.bf16.mxu1 %v1326_v32  ;;  %v869_v32 = vpop.permute.xlu0 %868 }
 0x7c6   : > { %951 = vmatpush2.bf16.msra.mxu1 %v906_v11 }
 0x7c9   : > { %953 = vmatmul.mubr.bf16.vlgmr.msra.gmra.mxu1 %v1255_v12 }
 0x889   : > { %v954_v16 = vpop.f32.mrf.mxu1 }
 0x88a   : > { %v955_v43 = vadd.f32 %v954_v16, %v864_v15 }
 0x88b   : > { %v956_v17 = vpop.f32.mrf.mxu1 }
 0x88c   : > { %v1015_v18 = vadd.f32 %v1008_v13, %v955_v43 }
 0x88d   : > { %v957_v19 = vpop.f32.mrf.mxu1 }
 0x88e   : > { %v1017_v20 = vmul.f32 0.70710677, %v1015_v18  ;;  %v958_v21 = vadd.f32 %v957_v19, %v869_v32 }
 0x88f   : > { %v959_v23 = vpop.f32.mrf.mxu1 }
 0x890   : > { %1019 = vst.msk [vmem:[%s379_s13] sm:$0xff] %vm703_vm9, %v1017_v20  ;;  %v1016_v26 = vadd.f32 %v1011_v25, %v958_v21 }
 0x892   : > { %v1018_v27 = vmul.f32 0.70710677, %v1016_v26 }
 0x894   : > { %1020 = vst.msk [vmem:[%s379_s13 + $0x8] sm:$0xff] %vm703_vm9, %v1018_v27 }
 0x895   : > { %1277 = shalt.err (!%p1274_p3)
}
 0x896   : > { %s1278_s25 = scalar_lea.hbm %s1668_s14, 256  ;;  %s1282_s24 = scalar_lea.hbm %s1725_s11, 512 }
 0x897   : > { %p1279_p4 = scmp.ne.s32.totalorder %s1668_s14, %s1278_s25  ;;  %p1283_p9 = scmp.lt.s32.totalorder %s1668_s14, %s1725_s11 }
 0x898   : > { %p1284_p10 = scmp.lt.s32.totalorder %s1282_s24, %s1278_s25 }
 0x899   : > { %p1280_p7 = pnand %p1279_p4, %p1446_p5 }
 0x89a   : > { %p1285_p11 = por %p1284_p10, %p1283_p9 }
 0x89b   : > { %p1281_p8 = pneg %p1280_p7 }
 0x89d   : > { %p1286_p12 = pnand %p1285_p11, %p1281_p8 }
 0x89f   : > { %1289 = shalt.err (!%p1286_p12)
}
 0x8a0   : > { %s1347_s16 = smov 128   ;;  %s1745_s22 = smov 8  }
 0x8a1   : > { %1151 = dma.vmem_to_hbm [thread:$0]  (%p1446_p5), %s1670_s15, 256, %s1668_s14, %s1673_s21, %s1347_s16, %s1347_s16, %s1745_s22  }
 0x8a2 PF: > { %p1157_p13 = scmp.ge.s32.totalorder %s1324_s20, 2  ;;  %s1050_s29 = sand.u32 1, %s1312_s17  }
 0x8a3   : > { %s1051_s25 = scalar_lea.sflag [#allocation3], %s1050_s29 }
 0x8a4   : > { %p1154_p0 = pnand %p1157_p13, %p1450_p6 }
 0x8a6   : > { %p1155_p1 = pneg %p1154_p0 }
 0x8a8   : > { %1307 = dma.done.wait (%p1155_p1), %s1051_s25, 256  }
 0x8a9   : > { %1309 = vsyncadd (%p1155_p1), %s1051_s25, 4294967040  ;;  %p21_p2 = scmp.ge.s32.totalorder %s1433_s23, 4   ;;  %s1746_s17 = smov %s1316_s18 }
 0x8aa   : > { %s1747_s18 = smov %s1320_s19  ;;  %s1748_s19 = smov %s1444_s26 }
 0x8ab   : > { %s1749_s20 = smov %s1433_s23  ;;  %23 = sbr.rel (!%p21_p2) target bundleno = 5 (0x5), region = 102 }
 0x8b0   :  { %1056 = vsyncpa [#allocation3], 1 }
 0x8b1   :  { %1058 = vsyncpa [#allocation3 + $0x1], 1 }

</bundles_post_ra>
